<compile_context>
chip_gen: v7x
topology: tpu7x:2x2x1
jax: 0.10.0
libtpu: 0.0.40
codegen_flags: <defaults>
</compile_context>

<pallas_src>
import jax
import jax.numpy as jnp
from jax.experimental import pallas as pl
from jax.experimental.pallas import tpu as pltpu

INNER = 16   # inner_size in the PyTorch module
LANE = 128   # TPU lane width — output slab is lane-dense


def net_kernel(h_ref, fp_ref, w1a_ref, w1b_ref, b1_ref, w2_ref, b2_ref,
               out_ref, acc_ref):
    ni = pl.program_id(1)

    # ---- Decoder: streamed sum-pool over the node axis, accumulated in VMEM ----
    @pl.when(ni == 0)
    def _():
        acc_ref[...] = jnp.zeros_like(acc_ref)

    acc_ref[...] += jnp.sum(h_ref[...].astype(jnp.float32), axis=1)   # [TG, D]

    # ---- Net head: only on the last node tile of this graph tile ----
    @pl.when(ni == pl.num_programs(1) - 1)
    def _():
        pooled = acc_ref[...]          # [TG, D]
        fp = fp_ref[...]               # [TG, 2]
        w1b = w1b_ref[...]             # [2, D]

        # l1: concat([pooled, forcepair]) @ W1.T + b1, as a split matmul.
        # Pooled part on the MXU; the K=2 forcepair part stays on the VPU
        # (an MXU matmul with K=2 is almost pure push/pop latency).
        z = jnp.dot(pooled, w1a_ref[...], preferred_element_type=jnp.float32)
        z = (z
             + fp[:, 0:1] * w1b[0:1, :]
             + fp[:, 1:2] * w1b[1:2, :]
             + b1_ref[...])                                           # [TG, D]

        # leaky_relu (PyTorch default negative_slope = 0.01)
        z = jnp.where(z > 0, z, 0.01 * z)

        # l2: lane-width-1 matmul replaced by VPU multiply + XLU lane reduction.
        y = jnp.sum(z * w2_ref[...], axis=-1, keepdims=True) + b2_ref[...]  # [TG, 1]

        # Lane-dense store: broadcast the per-graph scalar across 128 lanes.
        out_ref[...] = jnp.broadcast_to(y, out_ref.shape)


def net_forward(h_atm, forcepair, w1, b1, w2, b2, *, tg=8, tn=128):
    """h_atm: [G, N, D], forcepair: [G, 2],
       w1: [D, D+2], b1: [D], w2: [1, D], b2: [1]  (PyTorch Linear convention)."""
    G, N, D = h_atm.shape

    # --- weight plumbing (glue only, outside the kernel) ---
    w1a = jnp.asarray(w1[:, :D].T, jnp.float32)      # [D, D]  pooled part
    w1b = jnp.asarray(w1[:, D:].T, jnp.float32)      # [2, D]  forcepair part
    b1r = jnp.asarray(b1.reshape(1, D), jnp.float32)
    w2r = jnp.asarray(w2.reshape(1, D), jnp.float32)
    b2r = jnp.asarray(b2.reshape(1, 1), jnp.float32)

    # --- tile sizes: sublane-friendly (multiples of 8), capped by the data ---
    tg = max(8, ((tg + 7) // 8) * 8)
    tn = min(max(8, ((tn + 7) // 8) * 8), ((N + 7) // 8) * 8)

    # Pad graphs / nodes up to tile multiples (zero rows contribute nothing to
    # the sum-pool; padded graphs are sliced off below).
    g_pad = pl.cdiv(G, tg) * tg
    n_pad = pl.cdiv(N, tn) * tn
    h_p = jnp.pad(jnp.asarray(h_atm), ((0, g_pad - G), (0, n_pad - N), (0, 0)))
    fp_p = jnp.pad(jnp.asarray(forcepair, jnp.float32), ((0, g_pad - G), (0, 0)))

    grid = (g_pad // tg, n_pad // tn)   # (graph tiles [parallel], node tiles [reduction])

    out = pl.pallas_call(
        net_kernel,
        out_shape=jax.ShapeDtypeStruct((g_pad, LANE), jnp.float32),
        grid_spec=pltpu.PrefetchScalarGridSpec(
            num_scalar_prefetch=0,
            grid=grid,
            in_specs=[
                pl.BlockSpec((tg, tn, D), lambda gi, ni: (gi, ni, 0)),  # h_atm tile
                pl.BlockSpec((tg, 2),     lambda gi, ni: (gi, 0)),      # forcepair
                pl.BlockSpec((D, D),      lambda gi, ni: (0, 0)),       # W1a
                pl.BlockSpec((2, D),      lambda gi, ni: (0, 0)),       # W1b
                pl.BlockSpec((1, D),      lambda gi, ni: (0, 0)),       # b1
                pl.BlockSpec((1, D),      lambda gi, ni: (0, 0)),       # W2 row
                pl.BlockSpec((1, 1),      lambda gi, ni: (0, 0)),       # b2
            ],
            out_specs=pl.BlockSpec((tg, LANE), lambda gi, ni: (gi, 0)),
            scratch_shapes=[pltpu.VMEM((tg, D), jnp.float32)],          # pooled acc
        ),
        compiler_params=pltpu.CompilerParams(
            dimension_semantics=("parallel", "arbitrary"),
            # explicit, generation-safe VMEM budget (fits v7x's 64 MiB physical;
            # our double-buffered tiles need only a few MiB)
            vmem_limit_bytes=32 * 1024 * 1024,
        ),
    )(h_p, fp_p, w1a, w1b, b1r, w2r, b2r)

    # Drop graph padding + extra lanes; restore the PyTorch [G, 1] output shape.
    return out[:G, :1]


if __name__ == "__main__":
    G, N, D = 16, 256, INNER   # small but big enough to exercise both grid axes

    key = jax.random.PRNGKey(0)
    k_h, k_fp, k_w1, k_b1, k_w2, k_b2 = jax.random.split(key, 6)

    # Inputs (the "data" object fields the forward pass consumes)
    h_atm = jax.random.normal(k_h, (G, N, D), dtype=jnp.float32)
    forcepair = jax.random.normal(k_fp, (G, 2), dtype=jnp.float32)

    # Deterministic parameter init (shapes from Net.__init__)
    w1 = 0.1 * jax.random.normal(k_w1, (D, D + 2), dtype=jnp.float32)  # l1.weight
    b1 = 0.1 * jax.random.normal(k_b1, (D,), dtype=jnp.float32)        # l1.bias
    w2 = 0.1 * jax.random.normal(k_w2, (1, D), dtype=jnp.float32)      # l2.weight
    b2 = 0.1 * jax.random.normal(k_b2, (1,), dtype=jnp.float32)        # l2.bias

    out = net_forward(h_atm, forcepair, w1, b1, w2, b2, tg=8, tn=128)
    jax.block_until_ready(out)

    # Pure-JAX reference for sanity check
    pooled = h_atm.sum(axis=1)
    x = jnp.concatenate([pooled, forcepair], axis=-1)
    z = x @ w1.T + b1
    z = jnp.where(z > 0, z, 0.01 * z)
    ref = z @ w2.T + b2
    assert jnp.allclose(out, ref, atol=1e-4, rtol=1e-4), \
        float(jnp.max(jnp.abs(out - ref)))

    print("KERNEL_OK")
</pallas_src>

<mosaic_0001>
module attributes {stable_mosaic.version = 11 : i64} {
  func.func @net_kernel(%arg0: i32, %arg1: i32, %arg2: memref<8x128x16xf32, #tpu.memory_space<vmem>>, %arg3: memref<8x2xf32, #tpu.memory_space<vmem>>, %arg4: memref<16x16xf32, #tpu.memory_space<vmem>>, %arg5: memref<2x16xf32, #tpu.memory_space<vmem>>, %arg6: memref<1x16xf32, #tpu.memory_space<vmem>>, %arg7: memref<1x16xf32, #tpu.memory_space<vmem>>, %arg8: memref<1x1xf32, #tpu.memory_space<vmem>>, %arg9: memref<8x128xf32, #tpu.memory_space<vmem>>, %arg10: memref<8x16xf32, #tpu.memory_space<vmem>>) attributes {dimension_semantics = [#tpu.dimension_semantics<parallel>, #tpu.dimension_semantics<arbitrary>], iteration_bounds = array<i64: 2, 2>, scalar_prefetch = 0 : i64, scratch_operands = 1 : i64, tpu.core_type = #tpu.core_type<tc>, window_params = [{transform_indices = @transform_0, window_bounds = array<i64: 8, 128, 16>}, {transform_indices = @transform_1, window_bounds = array<i64: 8, 2>}, {pipeline_mode = #tpu.pipeline_mode<synchronous>, transform_indices = @transform_2, window_bounds = array<i64: 16, 16>}, {pipeline_mode = #tpu.pipeline_mode<synchronous>, transform_indices = @transform_3, window_bounds = array<i64: 2, 16>}, {pipeline_mode = #tpu.pipeline_mode<synchronous>, transform_indices = @transform_4, window_bounds = array<i64: 1, 16>}, {pipeline_mode = #tpu.pipeline_mode<synchronous>, transform_indices = @transform_5, window_bounds = array<i64: 1, 16>}, {pipeline_mode = #tpu.pipeline_mode<synchronous>, transform_indices = @transform_6, window_bounds = array<i64: 1, 1>}, {transform_indices = @transform_7, window_bounds = array<i64: 8, 128>}]} {
    %c0_i32 = arith.constant 0 : i32
    %0 = arith.cmpi eq, %arg1, %c0_i32 : i32
    %1 = arith.extui %0 : i1 to i32
    %c0_i32_0 = arith.constant 0 : i32
    %2 = arith.cmpi ne, %1, %c0_i32_0 : i32
    scf.if %2 {
      %cst_8 = arith.constant 0.000000e+00 : f32
      %11 = vector.broadcast %cst_8 : f32 to vector<8x16xf32>
      %c0_9 = arith.constant 0 : index
      %c0_10 = arith.constant 0 : index
      %12 = vector.load %arg10[%c0_9, %c0_10] : memref<8x16xf32, #tpu.memory_space<vmem>>, vector<8x16xf32>
      tpu.vector_store %arg10[%c0_9, %c0_10], %11 {strides = array<i32>} : memref<8x16xf32, #tpu.memory_space<vmem>>, vector<8x16xf32>,
    } else {
    }
    %c0 = arith.constant 0 : index
    %c0_1 = arith.constant 0 : index
    %3 = vector.load %arg10[%c0, %c0_1] : memref<8x16xf32, #tpu.memory_space<vmem>>, vector<8x16xf32>
    %c0_2 = arith.constant 0 : index
    %c0_3 = arith.constant 0 : index
    %c0_4 = arith.constant 0 : index
    %4 = vector.load %arg2[%c0_2, %c0_3, %c0_4] : memref<8x128x16xf32, #tpu.memory_space<vmem>>, vector<8x128x16xf32>
    %cst = arith.constant dense<0.000000e+00> : vector<8x16xf32>
    %5 = vector.multi_reduction <add>, %4, %cst [1] : vector<8x128x16xf32> to vector<8x16xf32>
    %6 = arith.addf %3, %5 : vector<8x16xf32>
    %c0_5 = arith.constant 0 : index
    %c0_6 = arith.constant 0 : index
    %7 = vector.load %arg10[%c0_5, %c0_6] : memref<8x16xf32, #tpu.memory_space<vmem>>, vector<8x16xf32>
    tpu.vector_store %arg10[%c0_5, %c0_6], %6 {strides = array<i32>} : memref<8x16xf32, #tpu.memory_space<vmem>>, vector<8x16xf32>,
    %c1_i32 = arith.constant 1 : i32
    %8 = arith.cmpi eq, %arg1, %c1_i32 : i32
    %9 = arith.extui %8 : i1 to i32
    %c0_i32_7 = arith.constant 0 : i32
    %10 = arith.cmpi ne, %9, %c0_i32_7 : i32
    scf.if %10 {
      %c0_8 = arith.constant 0 : index
      %c0_9 = arith.constant 0 : index
      %11 = vector.load %arg10[%c0_8, %c0_9] : memref<8x16xf32, #tpu.memory_space<vmem>>, vector<8x16xf32>
      %c0_10 = arith.constant 0 : index
      %c0_11 = arith.constant 0 : index
      %12 = vector.load %arg3[%c0_10, %c0_11] : memref<8x2xf32, #tpu.memory_space<vmem>>, vector<8x2xf32>
      %c0_12 = arith.constant 0 : index
      %c0_13 = arith.constant 0 : index
      %13 = vector.load %arg5[%c0_12, %c0_13] : memref<2x16xf32, #tpu.memory_space<vmem>>, vector<2x16xf32>
      %c0_14 = arith.constant 0 : index
      %c0_15 = arith.constant 0 : index
      %14 = vector.load %arg4[%c0_14, %c0_15] : memref<16x16xf32, #tpu.memory_space<vmem>>, vector<16x16xf32>
      %cst_16 = arith.constant dense<0.000000e+00> : vector<8x16xf32>
      %15 = tpu.matmul %11, %14, %cst_16 {dimension_numbers = #tpu.dot_dimension_numbers<[1], [0], [0], [1], [0, 0, 1, 1], [], []>} : vector<8x16xf32>, vector<16x16xf32>, vector<8x16xf32> -> vector<8x16xf32>
      %16 = vector.extract_strided_slice %12 {offsets = [0, 0], sizes = [8, 1], strides = [1, 1]} : vector<8x2xf32> to vector<8x1xf32>
      %17 = vector.extract_strided_slice %13 {offsets = [0, 0], sizes = [1, 16], strides = [1, 1]} : vector<2x16xf32> to vector<1x16xf32>
      %18 = vector.broadcast %16 : vector<8x1xf32> to vector<8x16xf32>
      %19 = vector.broadcast %17 : vector<1x16xf32> to vector<8x16xf32>
      %20 = arith.mulf %18, %19 : vector<8x16xf32>
      %21 = arith.addf %15, %20 : vector<8x16xf32>
      %22 = vector.extract_strided_slice %12 {offsets = [0, 1], sizes = [8, 1], strides = [1, 1]} : vector<8x2xf32> to vector<8x1xf32>
      %23 = vector.extract_strided_slice %13 {offsets = [1, 0], sizes = [1, 16], strides = [1, 1]} : vector<2x16xf32> to vector<1x16xf32>
      %24 = vector.broadcast %22 : vector<8x1xf32> to vector<8x16xf32>
      %25 = vector.broadcast %23 : vector<1x16xf32> to vector<8x16xf32>
      %26 = arith.mulf %24, %25 : vector<8x16xf32>
      %27 = arith.addf %21, %26 : vector<8x16xf32>
      %c0_17 = arith.constant 0 : index
      %c0_18 = arith.constant 0 : index
      %28 = vector.load %arg6[%c0_17, %c0_18] : memref<1x16xf32, #tpu.memory_space<vmem>>, vector<1x16xf32>
      %29 = vector.broadcast %28 : vector<1x16xf32> to vector<8x16xf32>
      %30 = arith.addf %27, %29 : vector<8x16xf32>
      %cst_19 = arith.constant 0.000000e+00 : f32
      %31 = vector.broadcast %cst_19 : f32 to vector<8x16xf32>
      %32 = arith.cmpf ogt, %30, %31 : vector<8x16xf32>
      %cst_20 = arith.constant 0.00999999977 : f32
      %33 = vector.broadcast %cst_20 : f32 to vector<8x16xf32>
      %34 = arith.mulf %33, %30 : vector<8x16xf32>
      %35 = arith.select %32, %30, %34 : vector<8x16xi1>, vector<8x16xf32>
      %c0_21 = arith.constant 0 : index
      %c0_22 = arith.constant 0 : index
      %36 = vector.load %arg7[%c0_21, %c0_22] : memref<1x16xf32, #tpu.memory_space<vmem>>, vector<1x16xf32>
      %37 = vector.broadcast %36 : vector<1x16xf32> to vector<8x16xf32>
      %38 = arith.mulf %35, %37 : vector<8x16xf32>
      %cst_23 = arith.constant dense<0.000000e+00> : vector<8xf32>
      %39 = vector.multi_reduction <add>, %38, %cst_23 [1] : vector<8x16xf32> to vector<8xf32>
      %40 = vector.shape_cast %39 : vector<8xf32> to vector<8x1xf32>
      %c0_24 = arith.constant 0 : index
      %c0_25 = arith.constant 0 : index
      %41 = vector.load %arg8[%c0_24, %c0_25] : memref<1x1xf32, #tpu.memory_space<vmem>>, vector<1x1xf32>
      %42 = vector.broadcast %41 : vector<1x1xf32> to vector<8x1xf32>
      %43 = arith.addf %40, %42 : vector<8x1xf32>
      %44 = vector.shape_cast %43 : vector<8x1xf32> to vector<8x1xf32>
      %45 = vector.broadcast %44 : vector<8x1xf32> to vector<8x128xf32>
      %c0_26 = arith.constant 0 : index
      %c0_27 = arith.constant 0 : index
      %46 = vector.load %arg9[%c0_26, %c0_27] : memref<8x128xf32, #tpu.memory_space<vmem>>, vector<8x128xf32>
      tpu.vector_store %arg9[%c0_26, %c0_27], %45 {strides = array<i32>} : memref<8x128xf32, #tpu.memory_space<vmem>>, vector<8x128xf32>,
    } else {
    }
    return
  }
  func.func @transform_0(%arg0: i32, %arg1: i32) -> (i32, i32, i32) {
    %c0_i32 = arith.constant 0 : i32
    %c0_i32_0 = arith.constant 0 : i32
    return %arg0, %arg1, %c0_i32 : i32, i32, i32
  }
  func.func @transform_1(%arg0: i32, %arg1: i32) -> (i32, i32) {
    %c0_i32 = arith.constant 0 : i32
    %c0_i32_0 = arith.constant 0 : i32
    return %arg0, %c0_i32 : i32, i32
  }
  func.func @transform_2(%arg0: i32, %arg1: i32) -> (i32, i32) {
    %c0_i32 = arith.constant 0 : i32
    %c0_i32_0 = arith.constant 0 : i32
    %c0_i32_1 = arith.constant 0 : i32
    return %c0_i32, %c0_i32_0 : i32, i32
  }
  func.func @transform_3(%arg0: i32, %arg1: i32) -> (i32, i32) {
    %c0_i32 = arith.constant 0 : i32
    %c0_i32_0 = arith.constant 0 : i32
    %c0_i32_1 = arith.constant 0 : i32
    return %c0_i32, %c0_i32_0 : i32, i32
  }
  func.func @transform_4(%arg0: i32, %arg1: i32) -> (i32, i32) {
    %c0_i32 = arith.constant 0 : i32
    %c0_i32_0 = arith.constant 0 : i32
    %c0_i32_1 = arith.constant 0 : i32
    return %c0_i32, %c0_i32_0 : i32, i32
  }
  func.func @transform_5(%arg0: i32, %arg1: i32) -> (i32, i32) {
    %c0_i32 = arith.constant 0 : i32
    %c0_i32_0 = arith.constant 0 : i32
    %c0_i32_1 = arith.constant 0 : i32
    return %c0_i32, %c0_i32_0 : i32, i32
  }
  func.func @transform_6(%arg0: i32, %arg1: i32) -> (i32, i32) {
    %c0_i32 = arith.constant 0 : i32
    %c0_i32_0 = arith.constant 0 : i32
    %c0_i32_1 = arith.constant 0 : i32
    return %c0_i32, %c0_i32_0 : i32, i32
  }
  func.func @transform_7(%arg0: i32, %arg1: i32) -> (i32, i32) {
    %c0_i32 = arith.constant 0 : i32
    %c0_i32_0 = arith.constant 0 : i32
    return %arg0, %c0_i32 : i32, i32
  }
}

</mosaic_0001>

<bundles_post_ra>
// kernel: tpu_custom_call.1
= control target key start
LH: loop header
LB: loop body
LE: loop exit
PB: predicated region body
PF: predicated region fallthrough
CT: control target
= control target key end

     0   :  { %s2587_s0 = inlined_call_operand.vmem [shape: f32[16,256,16], index: 0, kind: input, shape index: {}]   ;;  %s2588_s1 = inlined_call_operand.vmem [shape: f32[16,2], index: 1, kind: input, shape index: {}]   ;;  %s2589_s2 = inlined_call_operand.vmem [shape: f32[16,16], index: 2, kind: input, shape index: {}]   ;;  %s2590_s3 = inlined_call_operand.vmem [shape: f32[2,16], index: 3, kind: input, shape index: {}]   ;;  %s2591_s4 = inlined_call_operand.vmem [shape: f32[1,16], index: 4, kind: input, shape index: {}]   ;;  %s2592_s5 = inlined_call_operand.vmem [shape: f32[1,16], index: 5, kind: input, shape index: {}]   ;;  %s2593_s6 = inlined_call_operand.<no memory space> [shape: f32[1,1], index: 6, kind: input, shape index: {}]   ;;  %s2594_s7 = inlined_call_operand.hbm [shape: f32[16,128], index: 7, kind: output, shape index: {}]  }
   0x1   :  { %2597 = sst [smem:[#allocation10_spill]] %s2587_s0  ;;  %v12_v0 = vstv %s2593_s6 }
   0x2   :  { %13 = vst [vmem:[#allocation3] sm:$0x1] %v12_v0 }
   0x3   :  { %14 = vsyncpa [#allocation6], 0 }
   0x4   :  { %16 = vsyncpa [#allocation6 + $0x1], 0  ;;  %s1854_s26 = smov 0   ;;  %s1856_s27 = smov 0  }
   0x5   :  { %s1858_s28 = smov 0   ;;  %s1860_s29 = smov 0  }
   0x6   :  { %s1862_s30 = smov 0   ;;  %s1864_s8 = smov 0  }
   0x7   :  { %s1866_s9 = smov 0   ;;  %s1868_s10 = smov 0  }
   0x8   :  { %s1870_s6 = smov 0   ;;  %s1872_s11 = smov 0  }
   0x9 LB: > { %s1558_s12 = sadd.s32 4294967295, %s1802_s11   ;;  %s1559_s13 = sadd.s32 4294967294, %s1802_s11   ;;  %s1802_s11 = sphi %s1872_s11, %s22_s11   ;;  %s1798_s6 = sphi %s1870_s6, %s2614_s6   ;;  %s1794_s10 = sphi %s1868_s10, %s2613_s10   ;;  %s1790_s9 = sphi %s1866_s9, %s2612_s9   ;;  %s1786_s8 = sphi %s1864_s8, %s2611_s8   ;;  %s1782_s30 = sphi %s1862_s30, %s2610_s30   ;;  %s1778_s29 = sphi %s1860_s29, %s2609_s29   ;;  %s1774_s28 = sphi %s1858_s28, %s2608_s28   ;;  %s1770_s27 = sphi %s1856_s27, %s2607_s27   ;;  %s1766_s26 = sphi %s1854_s26, %s2606_s26  }
   0xa   : > { %s31_s14 = sadd.s32 1, %s1794_s10  ;;  %s34_s15 = sadd.s32 1, %s1798_s6 }
   0xb   : > { %p32_p0 = scmp.ge.s32.totalorder %s31_s14, 2  ;;  %s43_s16 = sadd.s32 1, %s1782_s30 }
   0xc   : > { %p50_p1 = scmp.ne.s32.totalorder %s1782_s30, %s1778_s29  ;;  %p51_p2 = scmp.eq.s32.totalorder %s1802_s11, 0 }
   0xd   : > { %s2616_s14 = smov (%p32_p0, %s31_s14), 0  ;;  %s2618_s15 = smov (!%p32_p0, %s34_s15), %s1798_s6 }
   0xe   : > { %2598 = sst [smem:[#allocation8_spill]] %s2616_s14  ;;  %s39_s17 = ssub.s32 %s1794_s10, %s2616_s14 }
   0xf   : > { %p1917_p3 = por %p51_p2, %p50_p1  ;;  %p36_p4 = scmp.ge.s32.totalorder %s2618_s15, 2 }
  0x10   : > { %s200_s19 = sadd.s32 1, %s1774_s28  ;;  %p210_p5 = scmp.ne.s32.totalorder %s1774_s28, %s1770_s27 }
  0x11   : > { %p211_p6 = scmp.eq.s32.totalorder %s1558_s12, 3  ;;  %s2620_s15 = smov (%p36_p4, %s2618_s15), 0 }
  0x12   : > { %2600 = sst [smem:[#allocation9_spill]] %s2620_s15  ;;  %p216_p8 = scmp.ne.s32.totalorder %s1770_s27, %s1766_s26 }
  0x13   : > { %p1926_p7 = por %p211_p6, %p210_p5  ;;  %s38_s21 = ssub.s32 %s1798_s6, %s2620_s15 }
  0x14   : > { %p217_p9 = scmp.eq.s32.totalorder %s1559_s13, 3  ;;  %s40_s22 = sor.u32 %s39_s17, %s38_s21 }
  0x15   : > { %p198_p10 = scmp.eq.s32.totalorder %s38_s21, 0  ;;  %p41_p11 = scmp.eq.s32.totalorder %s40_s22, 0 }
  0x16   : > { %p1934_p12 = por %p217_p9, %p216_p8  ;;  %p1561_p13 = scmp.ge.s32.totalorder %s1802_s11, 4 }
  0x17   : > { %s1939_s24 = scalar_select %p198_p10, %s1774_s28, %s200_s19  }
  0x18   : > { %s1942_s25 = scalar_select %p41_p11, %s1782_s30, %s43_s16  }
  0x19   : > { %248 = sbr.rel (%p1561_p13) target bundleno = 106 (0x6a), region = 36 }
  0x20   : > { %251 = sbr.rel (!%p1917_p3) target bundleno = 106 (0x6a), region = 40  ;;  %s253_s12 = sand.u32 (%p1917_p3), 1, %s1782_s30  }
  0x21   : > { %s1564_s13 = sshll.u32 (%p1917_p3), %s1794_s10, 4  ;;  %s1562_s17 = sshll.u32 (%p1917_p3), %s253_s12, 10 }
  0x22   : > { %s1581_s21 = sshll.u32 (%p1917_p3), %s1798_s6, 8  ;;  %s2603_s0 = sld [smem:[#allocation10_spill]] (%p1917_p3) }
  0x23   : > { %s259_s22 = sadd.s32 (%p1917_p3), %s1581_s21, %s1564_s13  ;;  %s1958_s18 = scalar_lea.vmem (%p1917_p3), [#allocation4], %s1562_s17 }
  0x24   : > { %s1566_s15 = sshll.u32 (%p1917_p3), %s259_s22, 3 }
  0x28   : > { %s1953_s16 = scalar_lea.vmem %s2603_s0, %s1566_s15 }
  0x29   : > { %v543_v1 = vld [vmem:[%s1953_s16] sm:$0xff]  ;;  %v545_v2 = vld [vmem:[%s1953_s16 + $0x8] sm:$0xff]  ;;  %v547_v3 = vld [vmem:[%s1953_s16 + $0x10] sm:$0xff] }
  0x2a   : > { %544 = vst [vmem:[%s1958_s18] sm:$0xff] %v543_v1  ;;  %546 = vst [vmem:[%s1958_s18 + $0x8] sm:$0xff] %v545_v2  ;;  %v549_v4 = vld [vmem:[%s1953_s16 + $0x18] sm:$0xff]  ;;  %v551_v5 = vld [vmem:[%s1953_s16 + $0x20] sm:$0xff] }
  0x2b   : > { %548 = vst [vmem:[%s1958_s18 + $0x10] sm:$0xff] %v547_v3  ;;  %v553_v6 = vld [vmem:[%s1953_s16 + $0x28] sm:$0xff]  ;;  %550 = vst [vmem:[%s1958_s18 + $0x18] sm:$0xff] %v549_v4  ;;  %v555_v7 = vld [vmem:[%s1953_s16 + $0x30] sm:$0xff] }
  0x2c   : > { %552 = vst [vmem:[%s1958_s18 + $0x20] sm:$0xff] %v551_v5  ;;  %554 = vst [vmem:[%s1958_s18 + $0x28] sm:$0xff] %v553_v6  ;;  %v557_v8 = vld [vmem:[%s1953_s16 + $0x38] sm:$0xff]  ;;  %v559_v9 = vld [vmem:[%s1953_s16 + $0x40] sm:$0xff] }
  0x2d   : > { %556 = vst [vmem:[%s1958_s18 + $0x30] sm:$0xff] %v555_v7  ;;  %558 = vst [vmem:[%s1958_s18 + $0x38] sm:$0xff] %v557_v8  ;;  %v561_v10 = vld [vmem:[%s1953_s16 + $0x48] sm:$0xff]  ;;  %v563_v11 = vld [vmem:[%s1953_s16 + $0x50] sm:$0xff] }
  0x2e   : > { %560 = vst [vmem:[%s1958_s18 + $0x40] sm:$0xff] %v559_v9  ;;  %v565_v12 = vld [vmem:[%s1953_s16 + $0x58] sm:$0xff]  ;;  %562 = vst [vmem:[%s1958_s18 + $0x48] sm:$0xff] %v561_v10  ;;  %v567_v13 = vld [vmem:[%s1953_s16 + $0x60] sm:$0xff] }
  0x2f   : > { %564 = vst [vmem:[%s1958_s18 + $0x50] sm:$0xff] %v563_v11  ;;  %566 = vst [vmem:[%s1958_s18 + $0x58] sm:$0xff] %v565_v12  ;;  %v569_v14 = vld [vmem:[%s1953_s16 + $0x68] sm:$0xff]  ;;  %v571_v15 = vld [vmem:[%s1953_s16 + $0x70] sm:$0xff] }
  0x30   : > { %568 = vst [vmem:[%s1958_s18 + $0x60] sm:$0xff] %v567_v13  ;;  %570 = vst [vmem:[%s1958_s18 + $0x68] sm:$0xff] %v569_v14  ;;  %v573_v16 = vld [vmem:[%s1953_s16 + $0x78] sm:$0xff]  ;;  %v575_v17 = vld [vmem:[%s1953_s16 + $0x100] sm:$0xff] }
  0x31   : > { %572 = vst [vmem:[%s1958_s18 + $0x70] sm:$0xff] %v571_v15  ;;  %v577_v18 = vld [vmem:[%s1953_s16 + $0x108] sm:$0xff]  ;;  %574 = vst [vmem:[%s1958_s18 + $0x78] sm:$0xff] %v573_v16  ;;  %v579_v19 = vld [vmem:[%s1953_s16 + $0x110] sm:$0xff] }
  0x32   : > { %576 = vst [vmem:[%s1958_s18 + $0x80] sm:$0xff] %v575_v17  ;;  %578 = vst [vmem:[%s1958_s18 + $0x88] sm:$0xff] %v577_v18  ;;  %v581_v20 = vld [vmem:[%s1953_s16 + $0x118] sm:$0xff]  ;;  %v583_v21 = vld [vmem:[%s1953_s16 + $0x120] sm:$0xff] }
  0x33   : > { %580 = vst [vmem:[%s1958_s18 + $0x90] sm:$0xff] %v579_v19  ;;  %582 = vst [vmem:[%s1958_s18 + $0x98] sm:$0xff] %v581_v20  ;;  %v585_v22 = vld [vmem:[%s1953_s16 + $0x128] sm:$0xff]  ;;  %v587_v23 = vld [vmem:[%s1953_s16 + $0x130] sm:$0xff] }
  0x34   : > { %584 = vst [vmem:[%s1958_s18 + $0xa0] sm:$0xff] %v583_v21  ;;  %v589_v24 = vld [vmem:[%s1953_s16 + $0x138] sm:$0xff]  ;;  %586 = vst [vmem:[%s1958_s18 + $0xa8] sm:$0xff] %v585_v22  ;;  %v591_v25 = vld [vmem:[%s1953_s16 + $0x140] sm:$0xff] }
  0x35   : > { %588 = vst [vmem:[%s1958_s18 + $0xb0] sm:$0xff] %v587_v23  ;;  %590 = vst [vmem:[%s1958_s18 + $0xb8] sm:$0xff] %v589_v24  ;;  %v593_v26 = vld [vmem:[%s1953_s16 + $0x148] sm:$0xff]  ;;  %v595_v27 = vld [vmem:[%s1953_s16 + $0x150] sm:$0xff] }
  0x36   : > { %592 = vst [vmem:[%s1958_s18 + $0xc0] sm:$0xff] %v591_v25  ;;  %594 = vst [vmem:[%s1958_s18 + $0xc8] sm:$0xff] %v593_v26  ;;  %v597_v28 = vld [vmem:[%s1953_s16 + $0x158] sm:$0xff]  ;;  %v599_v29 = vld [vmem:[%s1953_s16 + $0x160] sm:$0xff] }
  0x37   : > { %596 = vst [vmem:[%s1958_s18 + $0xd0] sm:$0xff] %v595_v27  ;;  %v601_v30 = vld [vmem:[%s1953_s16 + $0x168] sm:$0xff]  ;;  %598 = vst [vmem:[%s1958_s18 + $0xd8] sm:$0xff] %v597_v28  ;;  %v603_v31 = vld [vmem:[%s1953_s16 + $0x170] sm:$0xff] }
  0x38   : > { %600 = vst [vmem:[%s1958_s18 + $0xe0] sm:$0xff] %v599_v29  ;;  %602 = vst [vmem:[%s1958_s18 + $0xe8] sm:$0xff] %v601_v30  ;;  %v605_v32 = vld [vmem:[%s1953_s16 + $0x178] sm:$0xff]  ;;  %v607_v33 = vld [vmem:[%s1953_s16 + $0x200] sm:$0xff] }
  0x39   : > { %604 = vst [vmem:[%s1958_s18 + $0xf0] sm:$0xff] %v603_v31  ;;  %606 = vst [vmem:[%s1958_s18 + $0xf8] sm:$0xff] %v605_v32  ;;  %v609_v34 = vld [vmem:[%s1953_s16 + $0x208] sm:$0xff]  ;;  %v611_v35 = vld [vmem:[%s1953_s16 + $0x210] sm:$0xff] }
  0x3a   : > { %608 = vst [vmem:[%s1958_s18 + $0x100] sm:$0xff] %v607_v33  ;;  %v613_v36 = vld [vmem:[%s1953_s16 + $0x218] sm:$0xff]  ;;  %610 = vst [vmem:[%s1958_s18 + $0x108] sm:$0xff] %v609_v34  ;;  %v615_v37 = vld [vmem:[%s1953_s16 + $0x220] sm:$0xff] }
  0x3b   : > { %612 = vst [vmem:[%s1958_s18 + $0x110] sm:$0xff] %v611_v35  ;;  %614 = vst [vmem:[%s1958_s18 + $0x118] sm:$0xff] %v613_v36  ;;  %v617_v38 = vld [vmem:[%s1953_s16 + $0x228] sm:$0xff]  ;;  %v619_v39 = vld [vmem:[%s1953_s16 + $0x230] sm:$0xff] }
  0x3c   : > { %616 = vst [vmem:[%s1958_s18 + $0x120] sm:$0xff] %v615_v37  ;;  %618 = vst [vmem:[%s1958_s18 + $0x128] sm:$0xff] %v617_v38  ;;  %v621_v40 = vld [vmem:[%s1953_s16 + $0x238] sm:$0xff]  ;;  %v623_v41 = vld [vmem:[%s1953_s16 + $0x240] sm:$0xff] }
  0x3d   : > { %620 = vst [vmem:[%s1958_s18 + $0x130] sm:$0xff] %v619_v39  ;;  %v625_v42 = vld [vmem:[%s1953_s16 + $0x248] sm:$0xff]  ;;  %622 = vst [vmem:[%s1958_s18 + $0x138] sm:$0xff] %v621_v40  ;;  %v627_v43 = vld [vmem:[%s1953_s16 + $0x250] sm:$0xff] }
  0x3e   : > { %624 = vst [vmem:[%s1958_s18 + $0x140] sm:$0xff] %v623_v41  ;;  %626 = vst [vmem:[%s1958_s18 + $0x148] sm:$0xff] %v625_v42  ;;  %v629_v44 = vld [vmem:[%s1953_s16 + $0x258] sm:$0xff]  ;;  %v631_v45 = vld [vmem:[%s1953_s16 + $0x260] sm:$0xff] }
  0x3f   : > { %628 = vst [vmem:[%s1958_s18 + $0x150] sm:$0xff] %v627_v43  ;;  %630 = vst [vmem:[%s1958_s18 + $0x158] sm:$0xff] %v629_v44  ;;  %v633_v46 = vld [vmem:[%s1953_s16 + $0x268] sm:$0xff]  ;;  %v635_v47 = vld [vmem:[%s1953_s16 + $0x270] sm:$0xff] }
  0x40   : > { %632 = vst [vmem:[%s1958_s18 + $0x160] sm:$0xff] %v631_v45  ;;  %v637_v48 = vld [vmem:[%s1953_s16 + $0x278] sm:$0xff]  ;;  %634 = vst [vmem:[%s1958_s18 + $0x168] sm:$0xff] %v633_v46  ;;  %v639_v49 = vld [vmem:[%s1953_s16 + $0x300] sm:$0xff] }
  0x41   : > { %636 = vst [vmem:[%s1958_s18 + $0x170] sm:$0xff] %v635_v47  ;;  %638 = vst [vmem:[%s1958_s18 + $0x178] sm:$0xff] %v637_v48  ;;  %v641_v50 = vld [vmem:[%s1953_s16 + $0x308] sm:$0xff]  ;;  %v643_v51 = vld [vmem:[%s1953_s16 + $0x310] sm:$0xff] }
  0x42   : > { %640 = vst [vmem:[%s1958_s18 + $0x180] sm:$0xff] %v639_v49  ;;  %642 = vst [vmem:[%s1958_s18 + $0x188] sm:$0xff] %v641_v50  ;;  %v645_v52 = vld [vmem:[%s1953_s16 + $0x318] sm:$0xff]  ;;  %v647_v53 = vld [vmem:[%s1953_s16 + $0x320] sm:$0xff] }
  0x43   : > { %644 = vst [vmem:[%s1958_s18 + $0x190] sm:$0xff] %v643_v51  ;;  %v649_v54 = vld [vmem:[%s1953_s16 + $0x328] sm:$0xff]  ;;  %646 = vst [vmem:[%s1958_s18 + $0x198] sm:$0xff] %v645_v52  ;;  %v651_v55 = vld [vmem:[%s1953_s16 + $0x330] sm:$0xff] }
  0x44   : > { %648 = vst [vmem:[%s1958_s18 + $0x1a0] sm:$0xff] %v647_v53  ;;  %650 = vst [vmem:[%s1958_s18 + $0x1a8] sm:$0xff] %v649_v54  ;;  %v653_v56 = vld [vmem:[%s1953_s16 + $0x338] sm:$0xff]  ;;  %v655_v57 = vld [vmem:[%s1953_s16 + $0x340] sm:$0xff] }
  0x45   : > { %652 = vst [vmem:[%s1958_s18 + $0x1b0] sm:$0xff] %v651_v55  ;;  %654 = vst [vmem:[%s1958_s18 + $0x1b8] sm:$0xff] %v653_v56  ;;  %v657_v58 = vld [vmem:[%s1953_s16 + $0x348] sm:$0xff]  ;;  %v659_v59 = vld [vmem:[%s1953_s16 + $0x350] sm:$0xff] }
  0x46   : > { %656 = vst [vmem:[%s1958_s18 + $0x1c0] sm:$0xff] %v655_v57  ;;  %v661_v60 = vld [vmem:[%s1953_s16 + $0x358] sm:$0xff]  ;;  %658 = vst [vmem:[%s1958_s18 + $0x1c8] sm:$0xff] %v657_v58  ;;  %v663_v61 = vld [vmem:[%s1953_s16 + $0x360] sm:$0xff] }
  0x47   : > { %660 = vst [vmem:[%s1958_s18 + $0x1d0] sm:$0xff] %v659_v59  ;;  %662 = vst [vmem:[%s1958_s18 + $0x1d8] sm:$0xff] %v661_v60  ;;  %v665_v62 = vld [vmem:[%s1953_s16 + $0x368] sm:$0xff]  ;;  %v667_v63 = vld [vmem:[%s1953_s16 + $0x370] sm:$0xff] }
  0x48   : > { %664 = vst [vmem:[%s1958_s18 + $0x1e0] sm:$0xff] %v663_v61  ;;  %666 = vst [vmem:[%s1958_s18 + $0x1e8] sm:$0xff] %v665_v62  ;;  %v669_v0 = vld [vmem:[%s1953_s16 + $0x378] sm:$0xff]  ;;  %v671_v1 = vld [vmem:[%s1953_s16 + $0x400] sm:$0xff] }
  0x49   : > { %668 = vst [vmem:[%s1958_s18 + $0x1f0] sm:$0xff] %v667_v63  ;;  %v673_v2 = vld [vmem:[%s1953_s16 + $0x408] sm:$0xff]  ;;  %670 = vst [vmem:[%s1958_s18 + $0x1f8] sm:$0xff] %v669_v0  ;;  %v675_v3 = vld [vmem:[%s1953_s16 + $0x410] sm:$0xff] }
  0x4a   : > { %672 = vst [vmem:[%s1958_s18 + $0x200] sm:$0xff] %v671_v1  ;;  %674 = vst [vmem:[%s1958_s18 + $0x208] sm:$0xff] %v673_v2  ;;  %v677_v4 = vld [vmem:[%s1953_s16 + $0x418] sm:$0xff]  ;;  %v679_v5 = vld [vmem:[%s1953_s16 + $0x420] sm:$0xff] }
  0x4b   : > { %676 = vst [vmem:[%s1958_s18 + $0x210] sm:$0xff] %v675_v3  ;;  %678 = vst [vmem:[%s1958_s18 + $0x218] sm:$0xff] %v677_v4  ;;  %v681_v6 = vld [vmem:[%s1953_s16 + $0x428] sm:$0xff]  ;;  %v683_v7 = vld [vmem:[%s1953_s16 + $0x430] sm:$0xff] }
  0x4c   : > { %680 = vst [vmem:[%s1958_s18 + $0x220] sm:$0xff] %v679_v5  ;;  %v685_v8 = vld [vmem:[%s1953_s16 + $0x438] sm:$0xff]  ;;  %682 = vst [vmem:[%s1958_s18 + $0x228] sm:$0xff] %v681_v6  ;;  %v687_v9 = vld [vmem:[%s1953_s16 + $0x440] sm:$0xff] }
  0x4d   : > { %684 = vst [vmem:[%s1958_s18 + $0x230] sm:$0xff] %v683_v7  ;;  %686 = vst [vmem:[%s1958_s18 + $0x238] sm:$0xff] %v685_v8  ;;  %v689_v10 = vld [vmem:[%s1953_s16 + $0x448] sm:$0xff]  ;;  %v691_v11 = vld [vmem:[%s1953_s16 + $0x450] sm:$0xff] }
  0x4e   : > { %688 = vst [vmem:[%s1958_s18 + $0x240] sm:$0xff] %v687_v9  ;;  %690 = vst [vmem:[%s1958_s18 + $0x248] sm:$0xff] %v689_v10  ;;  %v693_v12 = vld [vmem:[%s1953_s16 + $0x458] sm:$0xff]  ;;  %v695_v13 = vld [vmem:[%s1953_s16 + $0x460] sm:$0xff] }
  0x4f   : > { %692 = vst [vmem:[%s1958_s18 + $0x250] sm:$0xff] %v691_v11  ;;  %v697_v14 = vld [vmem:[%s1953_s16 + $0x468] sm:$0xff]  ;;  %694 = vst [vmem:[%s1958_s18 + $0x258] sm:$0xff] %v693_v12  ;;  %v699_v15 = vld [vmem:[%s1953_s16 + $0x470] sm:$0xff] }
  0x50   : > { %696 = vst [vmem:[%s1958_s18 + $0x260] sm:$0xff] %v695_v13  ;;  %698 = vst [vmem:[%s1958_s18 + $0x268] sm:$0xff] %v697_v14  ;;  %v701_v16 = vld [vmem:[%s1953_s16 + $0x478] sm:$0xff]  ;;  %v703_v17 = vld [vmem:[%s1953_s16 + $0x500] sm:$0xff] }
  0x51   : > { %700 = vst [vmem:[%s1958_s18 + $0x270] sm:$0xff] %v699_v15  ;;  %702 = vst [vmem:[%s1958_s18 + $0x278] sm:$0xff] %v701_v16  ;;  %v705_v18 = vld [vmem:[%s1953_s16 + $0x508] sm:$0xff]  ;;  %v707_v19 = vld [vmem:[%s1953_s16 + $0x510] sm:$0xff] }
  0x52   : > { %704 = vst [vmem:[%s1958_s18 + $0x280] sm:$0xff] %v703_v17  ;;  %v709_v20 = vld [vmem:[%s1953_s16 + $0x518] sm:$0xff]  ;;  %706 = vst [vmem:[%s1958_s18 + $0x288] sm:$0xff] %v705_v18  ;;  %v711_v21 = vld [vmem:[%s1953_s16 + $0x520] sm:$0xff] }
  0x53   : > { %708 = vst [vmem:[%s1958_s18 + $0x290] sm:$0xff] %v707_v19  ;;  %710 = vst [vmem:[%s1958_s18 + $0x298] sm:$0xff] %v709_v20  ;;  %v713_v22 = vld [vmem:[%s1953_s16 + $0x528] sm:$0xff]  ;;  %v715_v23 = vld [vmem:[%s1953_s16 + $0x530] sm:$0xff] }
  0x54   : > { %712 = vst [vmem:[%s1958_s18 + $0x2a0] sm:$0xff] %v711_v21  ;;  %714 = vst [vmem:[%s1958_s18 + $0x2a8] sm:$0xff] %v713_v22  ;;  %v717_v24 = vld [vmem:[%s1953_s16 + $0x538] sm:$0xff]  ;;  %v719_v25 = vld [vmem:[%s1953_s16 + $0x540] sm:$0xff] }
  0x55   : > { %716 = vst [vmem:[%s1958_s18 + $0x2b0] sm:$0xff] %v715_v23  ;;  %v721_v26 = vld [vmem:[%s1953_s16 + $0x548] sm:$0xff]  ;;  %718 = vst [vmem:[%s1958_s18 + $0x2b8] sm:$0xff] %v717_v24  ;;  %v723_v27 = vld [vmem:[%s1953_s16 + $0x550] sm:$0xff] }
  0x56   : > { %720 = vst [vmem:[%s1958_s18 + $0x2c0] sm:$0xff] %v719_v25  ;;  %722 = vst [vmem:[%s1958_s18 + $0x2c8] sm:$0xff] %v721_v26  ;;  %v725_v28 = vld [vmem:[%s1953_s16 + $0x558] sm:$0xff]  ;;  %v727_v29 = vld [vmem:[%s1953_s16 + $0x560] sm:$0xff] }
  0x57   : > { %724 = vst [vmem:[%s1958_s18 + $0x2d0] sm:$0xff] %v723_v27  ;;  %726 = vst [vmem:[%s1958_s18 + $0x2d8] sm:$0xff] %v725_v28  ;;  %v729_v30 = vld [vmem:[%s1953_s16 + $0x568] sm:$0xff]  ;;  %v731_v31 = vld [vmem:[%s1953_s16 + $0x570] sm:$0xff] }
  0x58   : > { %728 = vst [vmem:[%s1958_s18 + $0x2e0] sm:$0xff] %v727_v29  ;;  %v733_v32 = vld [vmem:[%s1953_s16 + $0x578] sm:$0xff]  ;;  %730 = vst [vmem:[%s1958_s18 + $0x2e8] sm:$0xff] %v729_v30  ;;  %v735_v33 = vld [vmem:[%s1953_s16 + $0x600] sm:$0xff] }
  0x59   : > { %732 = vst [vmem:[%s1958_s18 + $0x2f0] sm:$0xff] %v731_v31  ;;  %734 = vst [vmem:[%s1958_s18 + $0x2f8] sm:$0xff] %v733_v32  ;;  %v737_v34 = vld [vmem:[%s1953_s16 + $0x608] sm:$0xff]  ;;  %v739_v35 = vld [vmem:[%s1953_s16 + $0x610] sm:$0xff] }
  0x5a   : > { %736 = vst [vmem:[%s1958_s18 + $0x300] sm:$0xff] %v735_v33  ;;  %738 = vst [vmem:[%s1958_s18 + $0x308] sm:$0xff] %v737_v34  ;;  %v741_v36 = vld [vmem:[%s1953_s16 + $0x618] sm:$0xff]  ;;  %v743_v37 = vld [vmem:[%s1953_s16 + $0x620] sm:$0xff] }
  0x5b   : > { %740 = vst [vmem:[%s1958_s18 + $0x310] sm:$0xff] %v739_v35  ;;  %v745_v38 = vld [vmem:[%s1953_s16 + $0x628] sm:$0xff]  ;;  %742 = vst [vmem:[%s1958_s18 + $0x318] sm:$0xff] %v741_v36  ;;  %v747_v39 = vld [vmem:[%s1953_s16 + $0x630] sm:$0xff] }
  0x5c   : > { %744 = vst [vmem:[%s1958_s18 + $0x320] sm:$0xff] %v743_v37  ;;  %746 = vst [vmem:[%s1958_s18 + $0x328] sm:$0xff] %v745_v38  ;;  %v749_v40 = vld [vmem:[%s1953_s16 + $0x638] sm:$0xff]  ;;  %v751_v41 = vld [vmem:[%s1953_s16 + $0x640] sm:$0xff] }
  0x5d   : > { %748 = vst [vmem:[%s1958_s18 + $0x330] sm:$0xff] %v747_v39  ;;  %750 = vst [vmem:[%s1958_s18 + $0x338] sm:$0xff] %v749_v40  ;;  %v753_v42 = vld [vmem:[%s1953_s16 + $0x648] sm:$0xff]  ;;  %v755_v43 = vld [vmem:[%s1953_s16 + $0x650] sm:$0xff] }
  0x5e   : > { %752 = vst [vmem:[%s1958_s18 + $0x340] sm:$0xff] %v751_v41  ;;  %v757_v44 = vld [vmem:[%s1953_s16 + $0x658] sm:$0xff]  ;;  %754 = vst [vmem:[%s1958_s18 + $0x348] sm:$0xff] %v753_v42  ;;  %v759_v45 = vld [vmem:[%s1953_s16 + $0x660] sm:$0xff] }
  0x5f   : > { %756 = vst [vmem:[%s1958_s18 + $0x350] sm:$0xff] %v755_v43  ;;  %758 = vst [vmem:[%s1958_s18 + $0x358] sm:$0xff] %v757_v44  ;;  %v761_v46 = vld [vmem:[%s1953_s16 + $0x668] sm:$0xff]  ;;  %v763_v47 = vld [vmem:[%s1953_s16 + $0x670] sm:$0xff] }
  0x60   : > { %760 = vst [vmem:[%s1958_s18 + $0x360] sm:$0xff] %v759_v45  ;;  %762 = vst [vmem:[%s1958_s18 + $0x368] sm:$0xff] %v761_v46  ;;  %v765_v48 = vld [vmem:[%s1953_s16 + $0x678] sm:$0xff]  ;;  %v767_v49 = vld [vmem:[%s1953_s16 + $0x700] sm:$0xff] }
  0x61   : > { %764 = vst [vmem:[%s1958_s18 + $0x370] sm:$0xff] %v763_v47  ;;  %v769_v50 = vld [vmem:[%s1953_s16 + $0x708] sm:$0xff]  ;;  %766 = vst [vmem:[%s1958_s18 + $0x378] sm:$0xff] %v765_v48  ;;  %v771_v51 = vld [vmem:[%s1953_s16 + $0x710] sm:$0xff] }
  0x62   : > { %768 = vst [vmem:[%s1958_s18 + $0x380] sm:$0xff] %v767_v49  ;;  %770 = vst [vmem:[%s1958_s18 + $0x388] sm:$0xff] %v769_v50  ;;  %v773_v52 = vld [vmem:[%s1953_s16 + $0x718] sm:$0xff]  ;;  %v775_v53 = vld [vmem:[%s1953_s16 + $0x720] sm:$0xff] }
  0x63   : > { %772 = vst [vmem:[%s1958_s18 + $0x390] sm:$0xff] %v771_v51  ;;  %774 = vst [vmem:[%s1958_s18 + $0x398] sm:$0xff] %v773_v52  ;;  %v777_v54 = vld [vmem:[%s1953_s16 + $0x728] sm:$0xff]  ;;  %v779_v55 = vld [vmem:[%s1953_s16 + $0x730] sm:$0xff] }
  0x64   : > { %776 = vst [vmem:[%s1958_s18 + $0x3a0] sm:$0xff] %v775_v53  ;;  %v781_v56 = vld [vmem:[%s1953_s16 + $0x738] sm:$0xff]  ;;  %778 = vst [vmem:[%s1958_s18 + $0x3a8] sm:$0xff] %v777_v54  ;;  %v783_v57 = vld [vmem:[%s1953_s16 + $0x740] sm:$0xff] }
  0x65   : > { %780 = vst [vmem:[%s1958_s18 + $0x3b0] sm:$0xff] %v779_v55  ;;  %782 = vst [vmem:[%s1958_s18 + $0x3b8] sm:$0xff] %v781_v56  ;;  %v785_v58 = vld [vmem:[%s1953_s16 + $0x748] sm:$0xff]  ;;  %v787_v59 = vld [vmem:[%s1953_s16 + $0x750] sm:$0xff] }
  0x66   : > { %784 = vst [vmem:[%s1958_s18 + $0x3c0] sm:$0xff] %v783_v57  ;;  %786 = vst [vmem:[%s1958_s18 + $0x3c8] sm:$0xff] %v785_v58  ;;  %v789_v60 = vld [vmem:[%s1953_s16 + $0x758] sm:$0xff]  ;;  %v791_v61 = vld [vmem:[%s1953_s16 + $0x760] sm:$0xff] }
  0x67   : > { %788 = vst [vmem:[%s1958_s18 + $0x3d0] sm:$0xff] %v787_v59  ;;  %v793_v62 = vld [vmem:[%s1953_s16 + $0x768] sm:$0xff]  ;;  %790 = vst [vmem:[%s1958_s18 + $0x3d8] sm:$0xff] %v789_v60  ;;  %v795_v63 = vld [vmem:[%s1953_s16 + $0x770] sm:$0xff] }
  0x68   : > { %792 = vst [vmem:[%s1958_s18 + $0x3e0] sm:$0xff] %v791_v61  ;;  %794 = vst [vmem:[%s1958_s18 + $0x3e8] sm:$0xff] %v793_v62  ;;  %v797_v0 = vld [vmem:[%s1953_s16 + $0x778] sm:$0xff] }
  0x69   : > { %796 = vst [vmem:[%s1958_s18 + $0x3f0] sm:$0xff] %v795_v63  ;;  %798 = vst [vmem:[%s1958_s18 + $0x3f8] sm:$0xff] %v797_v0 }
  0x6a PF: > { %p1567_p0 = scmp.ge.s32.totalorder %s1802_s11, 1  ;;  %p810_p1 = scmp.lt.s32.totalorder %s1802_s11, 5 }
  0x6c   : > { %p811_p2 = pnand %p1567_p0, %p810_p1 }
  0x6d   : > { %s817_s14 = sand.u32 (!%p811_p2), 1, %s1778_s29   ;;  %s849_s15 = sand.u32 (!%p811_p2), 1, %s1770_s27  }
  0x6e   : > { %814 = sbr.rel (%p811_p2) target bundleno = 749 (0x2ed), region = 82  ;;  %s1568_s12 = sshll.u32 (!%p811_p2), %s817_s14, 10 }
  0x6f   : > { %s2219_s13 = sshll.u32 (!%p811_p2), %s849_s15, 3  ;;  %p854_p3 = scmp.lt.s32.totalorder (!%p811_p2), %s1790_s9, 1 }
  0x70   : > { %s2228_s18 = scalar_lea.vmem (!%p811_p2), [#allocation4], %s1568_s12  ;;  %s851_s0 = scalar_lea.vmem (!%p811_p2), [#allocation5], %s2219_s13 }
  0x71   : > { %p1571_p4 = scmp.ne.s32.totalorder (!%p811_p2), %s1786_s8, 0 }
  0x75   : > { %s855_s17 = scalar_select %p854_p3, %s1790_s9, 1 }
  0x76   : > { %861 = sbr.rel (%p1571_p4) target bundleno = 125 (0x7d), region = 90  ;;  %vm862_vm0 = vcmask (!%p1571_p4), 130048   ;;  %v1804_v1 = vmov (!%p1571_p4), 0.0  }
  0x77   : > { %s1570_s21 = sshll.u32 %s855_s17, 3  ;;  %863 = vst.msk [vmem:[#allocation2] sm:$0xff] (!%p1571_p4), %vm862_vm0, %v1804_v1 }
  0x78   : > { %s2226_s16 = scalar_lea.vmem %s2588_s1, %s1570_s21 }
  0x7d PF: > { %v865_v2 = vld [vmem:[%s2228_s18] sm:$0xff]  ;;  %v866_v3 = vld [vmem:[%s2228_s18 + $0x8] sm:$0xff]  ;;  %vm993_vm1 = vcmask 130048   ;;  %v867_v4 = vld [vmem:[%s2228_s18 + $0x10] sm:$0xff]  ;;  %vm1298_vm2 = vcmask 1041409   ;;  %vm1300_vm3 = vcmask 1042434  }
  0x7e   : > { %v868_v5 = vld [vmem:[%s2228_s18 + $0x18] sm:$0xff]  ;;  %v994_v6 = vsel %vm993_vm1, %v865_v2, 0.0  ;;  %v995_v7 = vsel %vm993_vm1, %v866_v3, 0.0  ;;  %v869_v8 = vld [vmem:[%s2228_s18 + $0x20] sm:$0xff]  ;;  %v997_v10 = vsel %vm993_vm1, %v867_v4, 0.0  ;;  %v870_v12 = vld [vmem:[%s2228_s18 + $0x28] sm:$0xff] }
  0x7f   : > { %v996_v9 = vadd.f32 %v995_v7, %v994_v6  ;;  %v999_v11 = vsel %vm993_vm1, %v868_v5, 0.0  ;;  %v871_v14 = vld [vmem:[%s2228_s18 + $0x30] sm:$0xff]  ;;  %v881_v15 = vld [vmem:[%s2228_s18 + $0x80] sm:$0xff]  ;;  %v1001_v16 = vsel %vm993_vm1, %v869_v8, 0.0  ;;  %v882_v17 = vld [vmem:[%s2228_s18 + $0x88] sm:$0xff]  ;;  %v1003_v22 = vsel %vm993_vm1, %v870_v12, 0.0 }
  0x80   : > { %v883_v18 = vld [vmem:[%s2228_s18 + $0x90] sm:$0xff]  ;;  %v884_v19 = vld [vmem:[%s2228_s18 + $0x98] sm:$0xff]  ;;  %v1031_v21 = vsel %vm993_vm1, %v881_v15, 0.0  ;;  %v1032_v23 = vsel %vm993_vm1, %v882_v17, 0.0  ;;  %v885_v26 = vld [vmem:[%s2228_s18 + $0xa0] sm:$0xff]  ;;  %v1005_v30 = vsel %vm993_vm1, %v871_v14, 0.0 }
  0x81   : > { %v998_v13 = vadd.f32 %v997_v10, %v996_v9  ;;  %v1034_v24 = vsel %vm993_vm1, %v883_v18, 0.0  ;;  %v872_v25 = vld [vmem:[%s2228_s18 + $0x38] sm:$0xff]  ;;  %v1033_v28 = vadd.f32 %v1032_v23, %v1031_v21  ;;  %v873_v29 = vld [vmem:[%s2228_s18 + $0x40] sm:$0xff]  ;;  %v1036_v31 = vsel %vm993_vm1, %v884_v19, 0.0  ;;  %v886_v32 = vld [vmem:[%s2228_s18 + $0xa8] sm:$0xff]  ;;  %p1572_p5 = scmp.ne.s32.totalorder %s1786_s8, 1 }
  0x82   : > { %v897_v35 = vld [vmem:[%s2228_s18 + $0x100] sm:$0xff]  ;;  %v898_v36 = vld [vmem:[%s2228_s18 + $0x108] sm:$0xff]  ;;  %v899_v37 = vld [vmem:[%s2228_s18 + $0x110] sm:$0xff]  ;;  %v1007_v38 = vsel %vm993_vm1, %v872_v25, 0.0  ;;  %v1038_v39 = vsel %vm993_vm1, %v885_v26, 0.0  ;;  %v1009_v44 = vsel %vm993_vm1, %v873_v29, 0.0 }
  0x83   : > { %v1000_v20 = vadd.f32 %v999_v11, %v998_v13  ;;  %v1035_v34 = vadd.f32 %v1034_v24, %v1033_v28  ;;  %v874_v40 = vld [vmem:[%s2228_s18 + $0x48] sm:$0xff]  ;;  %v887_v41 = vld [vmem:[%s2228_s18 + $0xb0] sm:$0xff]  ;;  %v900_v42 = vld [vmem:[%s2228_s18 + $0x118] sm:$0xff]  ;;  %v1040_v46 = vsel %vm993_vm1, %v886_v32, 0.0  ;;  %v1068_v47 = vsel %vm993_vm1, %v897_v35, 0.0 }
  0x84   : > { %v1069_v48 = vsel %vm993_vm1, %v898_v36, 0.0  ;;  %v1071_v49 = vsel %vm993_vm1, %v899_v37, 0.0  ;;  %v901_v50 = vld [vmem:[%s2228_s18 + $0x120] sm:$0xff]  ;;  %v1011_v54 = vsel %vm993_vm1, %v874_v40, 0.0  ;;  %v1042_v55 = vsel %vm993_vm1, %v887_v41, 0.0  ;;  %v875_v57 = vld [vmem:[%s2228_s18 + $0x50] sm:$0xff] }
  0x85   : > { %v1002_v27 = vadd.f32 %v1001_v16, %v1000_v20  ;;  %v1037_v45 = vadd.f32 %v1036_v31, %v1035_v34  ;;  %v1070_v53 = vadd.f32 %v1069_v48, %v1068_v47  ;;  %v1073_v56 = vsel %vm993_vm1, %v900_v42, 0.0  ;;  %v888_v58 = vld [vmem:[%s2228_s18 + $0xb8] sm:$0xff]  ;;  %v902_v59 = vld [vmem:[%s2228_s18 + $0x128] sm:$0xff]  ;;  %v903_v63 = vld [vmem:[%s2228_s18 + $0x130] sm:$0xff] }
  0x86   : > { %v1075_v0 = vsel %vm993_vm1, %v901_v50, 0.0  ;;  %v913_v1 = vld [vmem:[%s2228_s18 + $0x180] sm:$0xff]  ;;  %v914_v2 = vld [vmem:[%s2228_s18 + $0x188] sm:$0xff]  ;;  %v915_v3 = vld [vmem:[%s2228_s18 + $0x190] sm:$0xff]  ;;  %v1013_v7 = vsel %vm993_vm1, %v875_v57, 0.0  ;;  %v1044_v8 = vsel %vm993_vm1, %v888_v58, 0.0 }
  0x87   : > { %v1004_v33 = vadd.f32 %v1003_v22, %v1002_v27  ;;  %v1039_v52 = vadd.f32 %v1038_v39, %v1037_v45  ;;  %v1072_v62 = vadd.f32 %v1071_v49, %v1070_v53  ;;  %v1077_v9 = vsel %vm993_vm1, %v902_v59, 0.0  ;;  %v876_v10 = vld [vmem:[%s2228_s18 + $0x58] sm:$0xff]  ;;  %v889_v11 = vld [vmem:[%s2228_s18 + $0xc0] sm:$0xff]  ;;  %v890_v28 = vld [vmem:[%s2228_s18 + $0xc8] sm:$0xff] }
  0x88   : > { %v916_v12 = vld [vmem:[%s2228_s18 + $0x198] sm:$0xff]  ;;  %v1079_v15 = vsel %vm993_vm1, %v903_v63, 0.0  ;;  %v1105_v16 = vsel %vm993_vm1, %v913_v1, 0.0  ;;  %v1106_v17 = vsel %vm993_vm1, %v914_v2, 0.0  ;;  %v1108_v18 = vsel %vm993_vm1, %v915_v3, 0.0  ;;  %v917_v19 = vld [vmem:[%s2228_s18 + $0x1a0] sm:$0xff] }
  0x89   : > { %v1006_v43 = vadd.f32 %v1005_v30, %v1004_v33  ;;  %v1041_v61 = vadd.f32 %v1040_v46, %v1039_v52  ;;  %v1074_v6 = vadd.f32 %v1073_v56, %v1072_v62  ;;  %v904_v14 = vld [vmem:[%s2228_s18 + $0x138] sm:$0xff]  ;;  %v1107_v23 = vadd.f32 %v1106_v17, %v1105_v16  ;;  %v877_v27 = vld [vmem:[%s2228_s18 + $0x60] sm:$0xff]  ;;  %v918_v29 = vld [vmem:[%s2228_s18 + $0x1a8] sm:$0xff] }
  0x8a   : > { %v1015_v24 = vsel %vm993_vm1, %v876_v10, 0.0  ;;  %v1046_v25 = vsel %vm993_vm1, %v889_v11, 0.0  ;;  %v1110_v26 = vsel %vm993_vm1, %v916_v12, 0.0  ;;  %v1081_v31 = vsel %vm993_vm1, %v904_v14, 0.0  ;;  %v905_v33 = vld [vmem:[%s2228_s18 + $0x140] sm:$0xff]  ;;  %v878_v35 = vld [vmem:[%s2228_s18 + $0x68] sm:$0xff] }
  0x8b   : > { %v1008_v51 = vadd.f32 %v1007_v38, %v1006_v43  ;;  %v1043_v5 = vadd.f32 %v1042_v55, %v1041_v61  ;;  %v1076_v13 = vadd.f32 %v1075_v0, %v1074_v6  ;;  %v1109_v32 = vadd.f32 %v1108_v18, %v1107_v23  ;;  %v919_v36 = vld [vmem:[%s2228_s18 + $0x1b0] sm:$0xff]  ;;  %v920_v45 = vld [vmem:[%s2228_s18 + $0x1b8] sm:$0xff]  ;;  %v929_v46 = vld [vmem:[%s2228_s18 + $0x200] sm:$0xff] }
  0x8c   : > { %v1112_v34 = vsel %vm993_vm1, %v917_v19, 0.0  ;;  %v891_v40 = vld [vmem:[%s2228_s18 + $0xd0] sm:$0xff]  ;;  %v1017_v41 = vsel %vm993_vm1, %v877_v27, 0.0  ;;  %v1048_v42 = vsel %vm993_vm1, %v890_v28, 0.0  ;;  %v930_v47 = vld [vmem:[%s2228_s18 + $0x208] sm:$0xff]  ;;  %v1083_v48 = vsel %vm993_vm1, %v905_v33, 0.0 }
  0x8d   : > { %v1010_v60 = vadd.f32 %v1009_v44, %v1008_v51  ;;  %v1045_v21 = vadd.f32 %v1044_v8, %v1043_v5  ;;  %v1078_v22 = vadd.f32 %v1077_v9, %v1076_v13  ;;  %v1111_v39 = vadd.f32 %v1110_v26, %v1109_v32  ;;  %v906_v50 = vld [vmem:[%s2228_s18 + $0x148] sm:$0xff]  ;;  %v921_v53 = vld [vmem:[%s2228_s18 + $0x1c0] sm:$0xff]  ;;  %v932_v59 = vld [vmem:[%s2228_s18 + $0x218] sm:$0xff] }
  0x8e   : > { %v1114_v44 = vsel %vm993_vm1, %v918_v29, 0.0  ;;  %v1019_v51 = vsel %vm993_vm1, %v878_v35, 0.0  ;;  %v1116_v52 = vsel %vm993_vm1, %v919_v36, 0.0  ;;  %v1050_v57 = vsel %vm993_vm1, %v891_v40, 0.0  ;;  %v879_v0 = vld [vmem:[%s2228_s18 + $0x70] sm:$0xff]  ;;  %v892_v1 = vld [vmem:[%s2228_s18 + $0xd8] sm:$0xff] }
  0x8f   : > { %v1012_v4 = vadd.f32 %v1011_v54, %v1010_v60  ;;  %v1080_v30 = vadd.f32 %v1079_v15, %v1078_v22  ;;  %v1047_v38 = vadd.f32 %v1046_v25, %v1045_v21  ;;  %v1113_v49 = vadd.f32 %v1112_v34, %v1111_v39  ;;  %v931_v54 = vld [vmem:[%s2228_s18 + $0x210] sm:$0xff]  ;;  %v933_v5 = vld [vmem:[%s2228_s18 + $0x220] sm:$0xff]  ;;  %v922_v9 = vld [vmem:[%s2228_s18 + $0x1c8] sm:$0xff] }
  0x90   : > { %v1118_v61 = vsel %vm993_vm1, %v920_v45, 0.0  ;;  %v1142_v62 = vsel %vm993_vm1, %v929_v46, 0.0  ;;  %v1143_v63 = vsel %vm993_vm1, %v930_v47, 0.0  ;;  %v1085_v2 = vsel %vm993_vm1, %v906_v50, 0.0  ;;  %v934_v14 = vld [vmem:[%s2228_s18 + $0x228] sm:$0xff]  ;;  %v880_v19 = vld [vmem:[%s2228_s18 + $0x78] sm:$0xff] }
  0x91   : > { %v1014_v20 = vadd.f32 %v1013_v7, %v1012_v4  ;;  %v1082_v43 = vadd.f32 %v1081_v31, %v1080_v30  ;;  %v1049_v56 = vadd.f32 %v1048_v42, %v1047_v38  ;;  %v1115_v58 = vadd.f32 %v1114_v44, %v1113_v49  ;;  %v907_v4 = vld [vmem:[%s2228_s18 + $0x150] sm:$0xff]  ;;  %v908_v25 = vld [vmem:[%s2228_s18 + $0x158] sm:$0xff]  ;;  %v945_v31 = vld [vmem:[%s2228_s18 + $0x280] sm:$0xff] }
  0x92   : > { %v1120_v6 = vsel %vm993_vm1, %v921_v53, 0.0  ;;  %v1144_v7 = vadd.f32 %v1143_v63, %v1142_v62  ;;  %v1145_v8 = vsel %vm993_vm1, %v931_v54, 0.0  ;;  %v1147_v13 = vsel %vm993_vm1, %v932_v59, 0.0  ;;  %v935_v26 = vld [vmem:[%s2228_s18 + $0x230] sm:$0xff]  ;;  %v896_v35 = vld [vmem:[%s2228_s18 + $0xf8] sm:$0xff]  ;;  %v909_v47 = vld [vmem:[%s2228_s18 + $0x160] sm:$0xff] }
  0x93   : > { %v1016_v37 = vadd.f32 %v1015_v24, %v1014_v20  ;;  %v1084_v60 = vadd.f32 %v1083_v48, %v1082_v43  ;;  %v1117_v3 = vadd.f32 %v1116_v52, %v1115_v58  ;;  %v1051_v11 = vadd.f32 %v1050_v57, %v1049_v56  ;;  %v893_v20 = vld [vmem:[%s2228_s18 + $0xe0] sm:$0xff]  ;;  %v894_v24 = vld [vmem:[%s2228_s18 + $0xe8] sm:$0xff]  ;;  %v895_v29 = vld [vmem:[%s2228_s18 + $0xf0] sm:$0xff] }
  0x94   : > { %v1021_v15 = vsel %vm993_vm1, %v879_v0, 0.0  ;;  %v1052_v16 = vsel %vm993_vm1, %v892_v1, 0.0  ;;  %v1146_v18 = vadd.f32 %v1145_v8, %v1144_v7  ;;  %v1087_v21 = vsel %vm993_vm1, %v907_v4, 0.0  ;;  %v923_v30 = vld [vmem:[%s2228_s18 + $0x1d0] sm:$0xff]  ;;  %v936_v36 = vld [vmem:[%s2228_s18 + $0x238] sm:$0xff]  ;;  %v937_v48 = vld [vmem:[%s2228_s18 + $0x240] sm:$0xff] }
  0x95   : > { %v1018_v55 = vadd.f32 %v1017_v41, %v1016_v37  ;;  %v1119_v12 = vadd.f32 %v1118_v61, %v1117_v3  ;;  %v1086_v17 = vadd.f32 %v1085_v2, %v1084_v60  ;;  %v1149_v23 = vsel %vm993_vm1, %v933_v5, 0.0  ;;  %v946_v41 = vld [vmem:[%s2228_s18 + $0x288] sm:$0xff]  ;;  %v947_v42 = vld [vmem:[%s2228_s18 + $0x290] sm:$0xff]  ;;  %v924_v54 = vld [vmem:[%s2228_s18 + $0x1d8] sm:$0xff] }
  0x96   : > { %v1122_v27 = vsel %vm993_vm1, %v922_v9, 0.0  ;;  %v1148_v28 = vadd.f32 %v1147_v13, %v1146_v18  ;;  %v1053_v33 = vadd.f32 %v1052_v16, %v1051_v11  ;;  %v1151_v34 = vsel %vm993_vm1, %v934_v14, 0.0  ;;  %v910_v53 = vld [vmem:[%s2228_s18 + $0x168] sm:$0xff]  ;;  %v911_v1 = vld [vmem:[%s2228_s18 + $0x170] sm:$0xff]  ;;  %v949_v2 = vld [vmem:[%s2228_s18 + $0x2a0] sm:$0xff] }
  0x97   : > { %v1020_v10 = vadd.f32 %v1019_v51, %v1018_v55  ;;  %v1121_v22 = vadd.f32 %v1120_v6, %v1119_v12  ;;  %v1023_v37 = vsel %vm993_vm1, %v880_v19, 0.0  ;;  %v1054_v38 = vsel %vm993_vm1, %v893_v20, 0.0  ;;  %v948_v55 = vld [vmem:[%s2228_s18 + $0x298] sm:$0xff]  ;;  %v938_v60 = vld [vmem:[%s2228_s18 + $0x248] sm:$0xff]  ;;  %v939_v8 = vld [vmem:[%s2228_s18 + $0x250] sm:$0xff] }
  0x98   : > { %v1088_v39 = vadd.f32 %v1087_v21, %v1086_v17  ;;  %v1150_v40 = vadd.f32 %v1149_v23, %v1148_v28  ;;  %v1056_v43 = vsel %vm993_vm1, %v894_v24, 0.0  ;;  %v1089_v44 = vsel %vm993_vm1, %v908_v25, 0.0  ;;  %v912_v7 = vld [vmem:[%s2228_s18 + $0x178] sm:$0xff]  ;;  %v925_v13 = vld [vmem:[%s2228_s18 + $0x1e0] sm:$0xff]  ;;  %v926_v14 = vld [vmem:[%s2228_s18 + $0x1e8] sm:$0xff] }
  0x99   : > { %v1022_v32 = vadd.f32 %v1021_v15, %v1020_v10  ;;  %v1123_v45 = vadd.f32 %v1122_v27, %v1121_v22  ;;  %v1153_v46 = vsel %vm993_vm1, %v935_v26, 0.0  ;;  %v1058_v49 = vsel %vm993_vm1, %v895_v29, 0.0  ;;  %v950_v15 = vld [vmem:[%s2228_s18 + $0x2a8] sm:$0xff]  ;;  %v940_v20 = vld [vmem:[%s2228_s18 + $0x258] sm:$0xff]  ;;  %v951_v25 = vld [vmem:[%s2228_s18 + $0x2b0] sm:$0xff] }
  0x9a   : > { %v1124_v50 = vsel %vm993_vm1, %v923_v30, 0.0  ;;  %v1152_v51 = vadd.f32 %v1151_v34, %v1150_v40  ;;  %v1179_v52 = vsel %vm993_vm1, %v945_v31, 0.0  ;;  %v1055_v57 = vadd.f32 %v1054_v38, %v1053_v33  ;;  %v961_v26 = vld [vmem:[%s2228_s18 + $0x300] sm:$0xff]  ;;  %v963_v38 = vld [vmem:[%s2228_s18 + $0x310] sm:$0xff] }
  0x9b   : > { %v1024_v56 = vadd.f32 %v1023_v37, %v1022_v32  ;;  %v2366_v58 = vsel %vm993_vm1, %v896_v35, 0.0  ;;  %v1155_v59 = vsel %vm993_vm1, %v936_v36, 0.0  ;;  %v1090_v61 = vadd.f32 %v1089_v44, %v1088_v39  ;;  %v941_v31 = vld [vmem:[%s2228_s18 + $0x260] sm:$0xff]  ;;  %v962_v32 = vld [vmem:[%s2228_s18 + $0x308] sm:$0xff]  ;;  %v952_v37 = vld [vmem:[%s2228_s18 + $0x2b8] sm:$0xff] }
  0x9c   : > { %v1154_v62 = vadd.f32 %v1153_v46, %v1152_v51  ;;  %v1180_v63 = vsel %vm993_vm1, %v946_v41, 0.0  ;;  %v1182_v0 = vsel %vm993_vm1, %v947_v42, 0.0  ;;  %v1091_v3 = vsel %vm993_vm1, %v909_v47, 0.0  ;;  %v964_v44 = vld [vmem:[%s2228_s18 + $0x318] sm:$0xff] }
  0x9d   : > { %v1125_v4 = vadd.f32 %v1124_v50, %v1123_v45  ;;  %v1157_v5 = vsel %vm993_vm1, %v937_v48, 0.0  ;;  %v1181_v6 = vadd.f32 %v1180_v63, %v1179_v52  ;;  %v1093_v9 = vsel %vm993_vm1, %v910_v53, 0.0  ;;  %v953_v50 = vld [vmem:[%s2228_s18 + $0x2c0] sm:$0xff] }
  0x9e   : > { %v1126_v10 = vsel %vm993_vm1, %v924_v54, 0.0  ;;  %v1156_v11 = vadd.f32 %v1155_v59, %v1154_v62  ;;  %v1184_v12 = vsel %vm993_vm1, %v948_v55, 0.0  ;;  %v1025_v16 = vrot.slane %v1024_v56, 4  ;;  %v942_v54 = vld [vmem:[%s2228_s18 + $0x268] sm:$0xff]  ;;  %v965_v55 = vld [vmem:[%s2228_s18 + $0x320] sm:$0xff] }
  0x9f   : > { %v1057_v17 = vadd.f32 %v1056_v43, %v1055_v57  ;;  %v1159_v18 = vsel %vm993_vm1, %v938_v60, 0.0  ;;  %v1183_v19 = vadd.f32 %v1182_v0, %v1181_v6  ;;  %v1092_v21 = vadd.f32 %v1091_v3, %v1090_v61  ;;  %v927_v43 = vld [vmem:[%s2228_s18 + $0x1f0] sm:$0xff]  ;;  %v928_v61 = vld [vmem:[%s2228_s18 + $0x1f8] sm:$0xff]  ;;  %v954_v62 = vld [vmem:[%s2228_s18 + $0x2c8] sm:$0xff] }
  0xa0   : > { %v1095_v22 = vsel %vm993_vm1, %v911_v1, 0.0  ;;  %v1158_v23 = vadd.f32 %v1157_v5, %v1156_v11  ;;  %v1186_v24 = vsel %vm993_vm1, %v949_v2, 0.0  ;;  %v2391_v27 = vsel %vm993_vm1, %v912_v7, 0.0  ;;  %v943_v3 = vld [vmem:[%s2228_s18 + $0x270] sm:$0xff] }
  0xa1   : > { %v1127_v28 = vadd.f32 %v1126_v10, %v1125_v4  ;;  %v1161_v29 = vsel %vm993_vm1, %v939_v8, 0.0  ;;  %v1185_v30 = vadd.f32 %v1184_v12, %v1183_v19  ;;  %v1128_v33 = vsel %vm993_vm1, %v925_v13, 0.0  ;;  %v966_v4 = vld [vmem:[%s2228_s18 + $0x328] sm:$0xff]  ;;  %v967_v13 = vld [vmem:[%s2228_s18 + $0x330] sm:$0xff]  ;;  %v956_v19 = vld [vmem:[%s2228_s18 + $0x2d8] sm:$0xff] }
  0xa2   : > { %v1130_v34 = vsel %vm993_vm1, %v926_v14, 0.0  ;;  %v1160_v35 = vadd.f32 %v1159_v18, %v1158_v23  ;;  %v1188_v36 = vsel %vm993_vm1, %v950_v15, 0.0  ;;  %v2401_v39 = vadd.f32 %v1025_v16, %v1024_v56  ;;  %v977_v14 = vld [vmem:[%s2228_s18 + $0x380] sm:$0xff] }
  0xa3   : > { %v1059_v40 = vadd.f32 %v1058_v49, %v1057_v17  ;;  %v1163_v41 = vsel %vm993_vm1, %v940_v20, 0.0  ;;  %v1187_v42 = vadd.f32 %v1186_v24, %v1185_v30  ;;  %v1094_v45 = vadd.f32 %v1093_v9, %v1092_v21  ;;  %v955_v9 = vld [vmem:[%s2228_s18 + $0x2d0] sm:$0xff]  ;;  %v978_v20 = vld [vmem:[%s2228_s18 + $0x388] sm:$0xff] }
  0xa4   : > { %v1162_v46 = vadd.f32 %v1161_v29, %v1160_v35  ;;  %v1190_v47 = vsel %vm993_vm1, %v951_v25, 0.0  ;;  %v1216_v48 = vsel %vm993_vm1, %v961_v26, 0.0  ;;  %v1129_v51 = vadd.f32 %v1128_v33, %v1127_v28  ;;  %v979_v21 = vld [vmem:[%s2228_s18 + $0x390] sm:$0xff]  ;;  %v944_v26 = vld [vmem:[%s2228_s18 + $0x278] sm:$0xff]  ;;  %v957_v33 = vld [vmem:[%s2228_s18 + $0x2e0] sm:$0xff] }
  0xa5   : > { %v1165_v52 = vsel %vm993_vm1, %v941_v31, 0.0  ;;  %v1189_v49 = vadd.f32 %v1188_v36, %v1187_v42  ;;  %v1217_v53 = vsel %vm993_vm1, %v962_v32, 0.0  ;;  %v1192_v57 = vsel %vm993_vm1, %v952_v37, 0.0  ;;  %v968_v28 = vld [vmem:[%s2228_s18 + $0x338] sm:$0xff] }
  0xa6   : > { %v1164_v56 = vadd.f32 %v1163_v41, %v1162_v46  ;;  %v1218_v59 = vadd.f32 %v1217_v53, %v1216_v48  ;;  %v1219_v60 = vsel %vm993_vm1, %v963_v38, 0.0  ;;  %v2418_v63 = vadd.f32 %v2366_v58, %v1059_v40  ;;  %v969_v40 = vld [vmem:[%s2228_s18 + $0x340] sm:$0xff] }
  0xa7   : > { %v1132_v0 = vsel %vm993_vm1, %v927_v43, 0.0  ;;  %v1191_v1 = vadd.f32 %v1190_v47, %v1189_v49  ;;  %v1221_v2 = vsel %vm993_vm1, %v964_v44, 0.0  ;;  %v1096_v5 = vadd.f32 %v1095_v22, %v1094_v45  ;;  %v958_v44 = vld [vmem:[%s2228_s18 + $0x2e8] sm:$0xff]  ;;  %v981_v45 = vld [vmem:[%s2228_s18 + $0x3a0] sm:$0xff] }
  0xa8   : > { %v1166_v6 = vadd.f32 %v1165_v52, %v1164_v56  ;;  %v1194_v7 = vsel %vm993_vm1, %v953_v50, 0.0  ;;  %v1220_v8 = vadd.f32 %v1219_v60, %v1218_v59  ;;  %v1131_v10 = vadd.f32 %v1130_v34, %v1129_v51  ;;  %v980_v34 = vld [vmem:[%s2228_s18 + $0x398] sm:$0xff]  ;;  %v970_v51 = vld [vmem:[%s2228_s18 + $0x348] sm:$0xff] }
  0xa9   : > { %v1167_v58 = vsel %vm993_vm1, %v942_v54, 0.0  ;;  %v1193_v11 = vadd.f32 %v1192_v57, %v1191_v1  ;;  %v1223_v12 = vsel %vm993_vm1, %v965_v55, 0.0  ;;  %v1027_v15 = vrot.slane %v2401_v39, 2  ;;  %v959_v55 = vld [vmem:[%s2228_s18 + $0x2f0] sm:$0xff]  ;;  %v982_v56 = vld [vmem:[%s2228_s18 + $0x3a8] sm:$0xff] }
  0xaa   : > { %v1134_v16 = vsel %vm993_vm1, %v928_v61, 0.0  ;;  %v1196_v17 = vsel %vm993_vm1, %v954_v62, 0.0  ;;  %v1222_v18 = vadd.f32 %v1221_v2, %v1220_v8  ;;  %v1062_v22 = vrot.slane %v2418_v63, 4  ;;  %v971_v62 = vld [vmem:[%s2228_s18 + $0x350] sm:$0xff] }
  0xab   : > { %v1169_v23 = vsel %vm993_vm1, %v943_v3, 0.0  ;;  %v1195_v24 = vadd.f32 %v1194_v7, %v1193_v11  ;;  %v1225_v25 = vsel %vm993_vm1, %v966_v4, 0.0  ;;  %v1098_v29 = vadd.f32 %v2391_v27, %v1096_v5  ;;  %v960_v4 = vld [vmem:[%s2228_s18 + $0x2f8] sm:$0xff]  ;;  %v983_v5 = vld [vmem:[%s2228_s18 + $0x3b0] sm:$0xff] }
  0xac   : > { %v1168_v30 = vadd.f32 %v1167_v58, %v1166_v6  ;;  %v1198_v31 = vsel %vm993_vm1, %v955_v9, 0.0  ;;  %v1224_v32 = vadd.f32 %v1223_v12, %v1222_v18  ;;  %v1133_v35 = vadd.f32 %v1132_v0, %v1131_v10  ;;  %v972_v10 = vld [vmem:[%s2228_s18 + $0x358] sm:$0xff] }
  0xad   : > { %v1197_v36 = vadd.f32 %v1196_v17, %v1195_v24  ;;  %v1227_v37 = vsel %vm993_vm1, %v967_v13, 0.0  ;;  %v1253_v38 = vsel %vm993_vm1, %v977_v14, 0.0  ;;  %v1200_v41 = vsel %vm993_vm1, %v956_v19, 0.0  ;;  %v984_v14 = vld [vmem:[%s2228_s18 + $0x3b8] sm:$0xff]  ;;  %v973_v19 = vld [vmem:[%s2228_s18 + $0x360] sm:$0xff] }
  0xae   : > { %v1226_v27 = vadd.f32 %v1225_v25, %v1224_v32  ;;  %v1254_v42 = vsel %vm993_vm1, %v978_v20, 0.0  ;;  %v1256_v43 = vsel %vm993_vm1, %v979_v21, 0.0  ;;  %v1171_v46 = vsel %vm993_vm1, %v944_v26, 0.0  ;;  %v985_v24 = vld [vmem:[%s2228_s18 + $0x3c0] sm:$0xff] }
  0xaf   : > { %v1199_v47 = vadd.f32 %v1198_v31, %v1197_v36  ;;  %v1229_v48 = vsel %vm993_vm1, %v968_v28, 0.0  ;;  %v1255_v50 = vadd.f32 %v1254_v42, %v1253_v38  ;;  %v1170_v52 = vadd.f32 %v1169_v23, %v1168_v30  ;;  %v974_v31 = vld [vmem:[%s2228_s18 + $0x368] sm:$0xff] }
  0xb0   : > { %v1202_v49 = vsel %vm993_vm1, %v957_v33, 0.0  ;;  %v1228_v53 = vadd.f32 %v1227_v37, %v1226_v27  ;;  %v1258_v54 = vsel %vm993_vm1, %v980_v34, 0.0  ;;  %v1135_v57 = vadd.f32 %v1134_v16, %v1133_v35 }
  0xb1   : > { %v1201_v59 = vadd.f32 %v1200_v41, %v1199_v47  ;;  %v1231_v60 = vsel %vm993_vm1, %v969_v40, 0.0  ;;  %v1257_v61 = vadd.f32 %v1256_v43, %v1255_v50  ;;  %v1099_v0 = vrot.slane %v1098_v29, 4  ;;  %v975_v40 = vld [vmem:[%s2228_s18 + $0x370] sm:$0xff]  ;;  %v976_v50 = vld [vmem:[%s2228_s18 + $0x378] sm:$0xff] }
  0xb2   : > { %v1204_v1 = vsel %vm993_vm1, %v958_v44, 0.0  ;;  %v1230_v2 = vadd.f32 %v1229_v48, %v1228_v53  ;;  %v1260_v3 = vsel %vm993_vm1, %v981_v45, 0.0  ;;  %v1063_v6 = vadd.f32 %v1062_v22, %v2418_v63  ;;  %v987_v44 = vld [vmem:[%s2228_s18 + $0x3d0] sm:$0xff]  ;;  %v988_v53 = vld [vmem:[%s2228_s18 + $0x3d8] sm:$0xff] }
  0xb3   : > { %v1203_v7 = vadd.f32 %v1202_v49, %v1201_v59  ;;  %v1233_v8 = vsel %vm993_vm1, %v970_v51, 0.0  ;;  %v1259_v9 = vadd.f32 %v1258_v54, %v1257_v61  ;;  %v1172_v58 = vadd.f32 %v1171_v46, %v1170_v52 }
  0xb4   : > { %v1206_v11 = vsel %vm993_vm1, %v959_v55, 0.0  ;;  %v1232_v12 = vadd.f32 %v1231_v60, %v1230_v2  ;;  %v1262_v13 = vsel %vm993_vm1, %v982_v56, 0.0  ;;  %v1136_v16 = vrot.slane %v1135_v57, 4  ;;  %v989_v60 = vld [vmem:[%s2228_s18 + $0x3e0] sm:$0xff] }
  0xb5   : > { %v1205_v17 = vadd.f32 %v1204_v1, %v1203_v7  ;;  %v1235_v18 = vsel %vm993_vm1, %v971_v62, 0.0  ;;  %v1261_v63 = vadd.f32 %v1260_v3, %v1259_v9  ;;  %v1100_v20 = vadd.f32 %v1099_v0, %v1098_v29  ;;  %v986_v29 = vld [vmem:[%s2228_s18 + $0x3c8] sm:$0xff] }
  0xb6   : > { %v1208_v21 = vsel %vm993_vm1, %v960_v4, 0.0  ;;  %v1234_v22 = vadd.f32 %v1233_v8, %v1232_v12  ;;  %v1264_v23 = vsel %vm993_vm1, %v983_v5, 0.0  ;;  %v1064_v25 = vrot.slane %v1063_v6, 2  ;;  %v990_v5 = vld [vmem:[%s2228_s18 + $0x3e8] sm:$0xff] }
  0xb7   : > { %v1207_v26 = vadd.f32 %v1206_v11, %v1205_v17  ;;  %v1237_v28 = vsel %vm993_vm1, %v972_v10, 0.0  ;;  %v1263_v30 = vadd.f32 %v1262_v13, %v1261_v63  ;;  %v1173_v32 = vrot.slane %v1172_v58, 4  ;;  %v992_v63 = vld [vmem:[%s2228_s18 + $0x3f8] sm:$0xff] }
  0xb8   : > { %v1236_v33 = vadd.f32 %v1235_v18, %v1234_v22  ;;  %v1266_v34 = vsel %vm993_vm1, %v984_v14, 0.0  ;;  %v1137_v35 = vadd.f32 %v1136_v16, %v1135_v57  ;;  %v1239_v37 = vsel %vm993_vm1, %v973_v19, 0.0 }
  0xb9   : > { %v1209_v36 = vadd.f32 %v1208_v21, %v1207_v26  ;;  %v1265_v38 = vadd.f32 %v1264_v23, %v1263_v30  ;;  %v1028_v41 = vadd.f32 %v1027_v15, %v2401_v39  ;;  %v1101_v27 = vrot.slane %v1100_v20, 2 }
  0xba   : > { %v1238_v42 = vadd.f32 %v1237_v28, %v1236_v33  ;;  %v1268_v43 = vsel %vm993_vm1, %v985_v24, 0.0  ;;  %v1065_v45 = vadd.f32 %v1064_v25, %v1063_v6  ;;  %v1241_v47 = vsel %vm993_vm1, %v974_v31, 0.0 }
  0xbb   : > { %v1210_v46 = vrot.slane %v1209_v36, 4  ;;  %v1267_v48 = vadd.f32 %v1266_v34, %v1265_v38  ;;  %v1174_v51 = vadd.f32 %v1173_v32, %v1172_v58  ;;  %v1270_v49 = vsel %vm993_vm1, %v986_v29, 0.0  ;;  %v991_v58 = vld [vmem:[%s2228_s18 + $0x3f0] sm:$0xff] }
  0xbc   : > { %v1240_v52 = vadd.f32 %v1239_v37, %v1238_v42  ;;  %v1138_v54 = vrot.slane %v1137_v35, 2  ;;  %v1243_v39 = vsel %vm993_vm1, %v975_v40, 0.0  ;;  %v1029_v55 = vrot.slane %v1028_v41, 1 }
  0xbd   : > { %v1269_v15 = vadd.f32 %v1268_v43, %v1267_v48  ;;  %v1102_v56 = vadd.f32 %v1101_v27, %v1100_v20  ;;  %v1272_v59 = vsel %vm993_vm1, %v987_v44, 0.0  ;;  %v1066_v61 = vrot.slane %v1065_v45, 1 }
  0xbe   : > { %v1242_v57 = vadd.f32 %v1241_v47, %v1240_v52  ;;  %v1211_v62 = vadd.f32 %v1210_v46, %v1209_v36  ;;  %v1245_v0 = vsel %vm993_vm1, %v976_v50, 0.0  ;;  %v1175_v2 = vrot.slane %v1174_v51, 2 }
  0xbf   : > { %v1271_v1 = vadd.f32 %v1270_v49, %v1269_v15  ;;  %v1274_v4 = vsel %vm993_vm1, %v988_v53, 0.0  ;;  %v1139_v6 = vadd.f32 %v1138_v54, %v1137_v35  ;;  %v1103_v8 = vrot.slane %v1102_v56, 1  ;;  %v1322_v54 = vld [vmem:[%s2589_s2] sm:$0xff] (!%p1572_p5) }
  0xc0   : > { %v1244_v3 = vadd.f32 %v1243_v39, %v1242_v57  ;;  %v1276_v10 = vsel %vm993_vm1, %v989_v60, 0.0  ;;  %v1030_v11 = vadd.f32 %v1029_v55, %v1028_v41  ;;  %v1067_v12 = vadd.f32 %v1066_v61, %v1065_v45  ;;  %v1323_v39 = vld [vmem:[%s2589_s2 + $0x8] sm:$0xff] (!%p1572_p5)  ;;  %v1320_v57 = vld [vmem:[%s2226_s16] sm:$0xff] (!%p1572_p5) }
  0xc1   : > { %v1273_v7 = vadd.f32 %v1272_v59, %v1271_v1  ;;  %v1212_v13 = vrot.slane %v1211_v62, 2  ;;  %v1176_v16 = vadd.f32 %v1175_v2, %v1174_v51  ;;  %v1278_v18 = vsel %vm993_vm1, %v990_v5, 0.0  ;;  %v864_v51 = vld [vmem:[#allocation2] sm:$0xff] }
  0xc2   : > { %v1246_v9 = vadd.f32 %v1245_v0, %v1244_v3  ;;  %v1140_v19 = vrot.slane %v1139_v6, 1  ;;  %v1104_v21 = vadd.f32 %v1103_v8, %v1102_v56  ;;  %v1280_v23 = vsel %vm993_vm1, %v991_v58, 0.0 }
  0xc3   : > { %v1275_v14 = vadd.f32 %v1274_v4, %v1273_v7  ;;  %v1213_v24 = vadd.f32 %v1212_v13, %v1211_v62  ;;  %v1299_v26 = vsel %vm1298_vm2, %v1067_v12, %v1030_v11  ;;  %v1177_v28 = vrot.slane %v1176_v16, 1  ;;  %v1321_v4 = vld [vmem:[%s2590_s3] sm:$0x3] (!%p1572_p5) }
  0xc4   : > { %v1247_v17 = vrot.slane %v1246_v9, 4  ;;  %v1282_v31 = vsel %vm993_vm1, %v992_v63, 0.0  ;;  %v1141_v32 = vadd.f32 %v1140_v19, %v1139_v6  ;;  %v1301_v29 = vsel %vm1300_vm3, %v1104_v21, %v1299_v26  ;;  %v1574_v12 = vld [vmem:[%s2591_s4] ss:$0 sm:$0xff] (!%p1572_p5) }
  0xc5   : > { %v1277_v20 = vadd.f32 %v1276_v10, %v1275_v14  ;;  %vm1302_vm4 = vcmask 1043459   ;;  %v1214_v35 = vrot.slane %v1213_v24, 1  ;;  %v1178_v37 = vadd.f32 %v1177_v28, %v1176_v16 }
  0xc6   : > { %v1248_v22 = vadd.f32 %v1247_v17, %v1246_v9  ;;  %v1303_v40 = vsel %vm1302_vm4, %v1141_v32, %v1301_v29  ;;  %vm1304_vm5 = vcmask 1044484   ;;  %vm1306_vm6 = vcmask 1045509   ;;  %v1575_v17 = vld [vmem:[%s2592_s5] ss:$0 sm:$0xff] (!%p1572_p5) }
  0xc7   : > { %v1279_v25 = vadd.f32 %v1278_v18, %v1277_v20  ;;  %v1215_v27 = vadd.f32 %v1214_v35, %v1213_v24  ;;  %v1305_v43 = vsel %vm1304_vm5, %v1178_v37, %v1303_v40  ;;  %vm1308_vm7 = vcmask 1046534   ;;  %v1576_v20 = vld [vmem:[#allocation3] ss:$0 sm:$0xff] (!%p1572_p5) }
  0xc8   : > { %v1249_v30 = vrot.slane %v1248_v22, 2  ;;  %vm1310_vm8 = vcmask 1047559   ;;  %v1805_v15 = vmov (!%p1572_p5), 0.0|0.0   ;;  %v1593_v55 = vpack.c.bf16 (!%p1572_p5), %v1323_v39, %v1322_v54 }
  0xc9   : > { %v1281_v33 = vadd.f32 %v1280_v23, %v1279_v25  ;;  %v1307_v47 = vsel %vm1306_vm6, %v1215_v27, %v1305_v43  ;;  %1592 = vmatprep.subr.bf16.mxu0 (!%p1572_p5), %v1805_v15  ;;  %vm1806_vm9 = vmmov (!%p1572_p5), 0   ;;  %v1807_v56 = vmov (!%p1572_p5), 0.0  }
  0xca   : > { %v1250_v34 = vadd.f32 %v1249_v30, %v1248_v22  ;;  %1589 = vmatprep.mubr.msk.f32.mxu0 (!%p1572_p5), %vm1806_vm9, %v1807_v56  ;;  %v1808_v59 = vmov (!%p1572_p5), 0   ;;  %1594 = vmatpush3.bf16.msra.mxu0 (!%p1572_p5), %v1593_v55  ;;  %v1809_v61 = vmov (!%p1572_p5), 1   ;;  %v1329_v62 = vlaneseq (!%p1572_p5) }
  0xcb   : > { %v1283_v36 = vadd.f32 %v1282_v31, %v1281_v33  ;;  %1688 = vset.pattern.permute.xlu0 (!%p1572_p5), %v1808_v59  ;;  %1690 = vset.pattern.permute.xlu1 (!%p1572_p5), %v1808_v59 }
  0xcc   : > { %v1251_v41 = vrot.slane %v1250_v34, 1  ;;  %1326 = vperm.xlu0 (!%p1572_p5), %1688, %v1320_v57   ;;  %v1330_v0 = vshrl.u32 (!%p1572_p5), %v1329_v62, 7 }
  0xcd   : > { %v1284_v38 = vrot.slane %v1283_v36, 4 }
  0xce   : > { %v1252_v45 = vadd.f32 %v1251_v41, %v1250_v34  ;;  %v1331_v2 = vsub.s32 (!%p1572_p5), 0, %v1330_v0  ;;  %v1413_v3 = vsub.s32 (!%p1572_p5), 1, %v1330_v0 }
  0xcf   : > { %v1285_v42 = vadd.f32 %v1284_v38, %v1283_v36 }
  0xd0   : > { %v1309_v50 = vsel %vm1308_vm7, %v1252_v45, %v1307_v47  ;;  %1689 = vset.pattern.permute.xlu0 (!%p1572_p5), %v1809_v61  ;;  %v1332_v5 = vrot.slane (!%p1572_p5), %v1321_v4, %v1331_v2  ;;  %v1414_v6 = vrot.slane (!%p1572_p5), %v1321_v4, %v1413_v3 }
  0xd1   : > { %v1286_v44 = vrot.slane %v1285_v42, 2  ;;  %1408 = vperm.xlu0 (!%p1572_p5), %1689, %v1320_v57  }
  0xd3   : > { %v1287_v46 = vadd.f32 %v1286_v44, %v1285_v42 }
  0xd5   : > { %v1288_v48 = vrot.slane %v1287_v46, 1  ;;  %1691 = vset.pattern.permute.xlu0 (!%p1572_p5), %v1808_v59 }
  0xd6   : > { %1318 = sbr.rel (%p1572_p5) target bundleno = 725 (0x2d5), region = 94 }
  0xd7   : > { %v1289_v52 = vadd.f32 %v1288_v48, %v1287_v46 }
  0xd9   : > { %v1311_v49 = vsel %vm1310_vm8, %v1289_v52, %v1309_v50 }
  0xda   : > { %v1313_v53 = vadd.f32 %v1311_v49, %v864_v51 }
  0xdc   : > { %1314 = vst.msk [vmem:[#allocation2] sm:$0xff] %vm993_vm1, %v1313_v53 }
  0xe3   : > { %v1319_v60 = vld [vmem:[#allocation2] sm:$0xff] }
  0xe4   : > { %1590 = vmatmul.mubr.msk.f32.vlgmr.msra.gmra.mrb[0].mxu0 %vm993_vm1, %v1319_v60 }
 0x14b   : > { %v1327_v1 = vpop.permute.xlu0 %1326 }
 0x14c   : > { %v1333_v8 = vmul.f32 %v1332_v5, %v1327_v1 }
 0x150   : > { %v1409_v7 = vpop.permute.xlu0 %1408 }
 0x151   : > { %v1415_v9 = vmul.f32 %v1414_v6, %v1409_v7 }
 0x1b7   : > { %v1403_v10 = vpop.f32.mrb[0].mxu0 }
 0x1b8   : > { %v1404_v58 = vadd.f32 %v1403_v10, %v1333_v8  ;;  %v1591_v11 = vpop.f32.mrb[1].mxu0 }
 0x1ba   : > { %v1416_v13 = vadd.f32 %v1415_v9, %v1404_v58 }
 0x1bc   : > { %v1424_v14 = vadd.f32 %v1574_v12, %v1416_v13 }
 0x1be   : > { %vm1425_vm10 = vcmp.gt.f32.partialorder %v1424_v14, 0.0  ;;  %v1426_v16 = vmul.f32 0.01, %v1424_v14 }
 0x1c0   : > { %v1427_v18 = vsel %vm1425_vm10, %v1424_v14, %v1426_v16 }
 0x1c1   : > { %v1435_v63 = vmul.f32 %v1575_v17, %v1427_v18 }
 0x1c3   : > { %v1436_v19 = vsel %vm993_vm1, %v1435_v63, 0.0 }
 0x1c4   : > { %1437 = vadd.xlane.f32.xlu1 %v1436_v19 }
 0x251   : > { %v1438_v21 = vpop.xlane.xlu1 %1437 }
 0x252   : > { %v1446_v22 = vadd.f32 %v1576_v20, %v1438_v21 }
 0x254   : > { %1449 = vperm.xlu1 %1690, %v1446_v22  }
 0x2d3   : > { %v1450_v23 = vpop.permute.xlu1 %1449 }
 0x2d4   : > { %1452 = vst [vmem:[%s851_s0] sm:$0xff] %v1450_v23 }
 0x2d5 PF: > { %s1578_s29 = sshll.u32 %s1790_s9, 7  ;;  %s1467_s8 = sshll.u32 %s851_s0, 4  ;;  %s1468_s8 = int_to_ptr.vmem [resolvable:$true] %s1467_s8 }
 0x2d6   : > { %s2530_s17 = scalar_lea.hbm %s2594_s7, %s1578_s29  ;;  %s1454_s21 = scalar_lea.sflag [#allocation6], %s849_s15 }
 0x2d7   : > { %s1692_s22 = scalar_lea.vmem %s1468_s8, 128  ;;  %s1810_s19 = smov [#allocation5]  }
 0x2d8   : > { %p1693_p6 = scmp.ne.s32.totalorder %s1468_s8, %s1692_s22  ;;  %s1696_s16 = sshll.u32 %s1810_s19, 4  ;;  %s1697_s16 = int_to_ptr.vmem [resolvable:$false] %s1696_s16 }
 0x2d9   : > { %s1698_s18 = scalar_lea.vmem %s1697_s16, 256  ;;  %p1699_p10 = scmp.lt.s32.totalorder %s1468_s8, %s1697_s16 }
 0x2da   : > { %p1694_p8 = pnand %p1693_p6, %p1926_p7  ;;  %p1700_p11 = scmp.lt.s32.totalorder %s1698_s18, %s1692_s22 }
 0x2dc   : > { %p1695_p9 = pneg %p1694_p8  ;;  %p1701_p13 = por %p1700_p11, %p1699_p10 }
 0x2de   : > { %p1702_p0 = pnand %p1701_p13, %p1695_p9 }
 0x2e0   : > { %1705 = shalt.err (!%p1702_p0)
}
 0x2e1   : > { %s1706_s0 = scalar_lea.hbm %s2530_s17, 128  ;;  %s1710_s13 = scalar_lea.hbm %s2594_s7, 256 }
 0x2e2   : > { %p1707_p1 = scmp.ne.s32.totalorder %s2530_s17, %s1706_s0  ;;  %p1711_p4 = scmp.lt.u32.totalorder %s2530_s17, %s2594_s7 }
 0x2e3   : > { %p1712_p5 = scmp.lt.u32.totalorder %s1710_s13, %s1706_s0  ;;  %p1714_p8 = scmp.lt.u32.totalorder %s1706_s0, %s2530_s17 }
 0x2e4   : > { %p1708_p2 = pnand %p1707_p1, %p1926_p7 }
 0x2e5   : > { %p1713_p6 = por %p1712_p5, %p1711_p4 }
 0x2e6   : > { %p1709_p3 = pneg %p1708_p2 }
 0x2e7   : > { %p1715_p9 = por %p1714_p8, %p1713_p6 }
 0x2e9   : > { %p1716_p10 = pnand %p1715_p9, %p1709_p3 }
 0x2eb   : > { %1719 = shalt.err (!%p1716_p10)
}
 0x2ec   : > { %1595 = dma.vmem_to_hbm [thread:$0]  (%p1926_p7), %s1468_s8, 128, %s2530_s17, %s1454_s21  }
 0x2ed PF: > { %p1601_p11 = scmp.ge.s32.totalorder %s1802_s11, 2  ;;  %s1479_s12 = sand.u32 1, %s1766_s26  }
 0x2ee   : > { %s1480_s22 = scalar_lea.sflag [#allocation6], %s1479_s12 }
 0x2ef   : > { %p1598_p13 = pnand %p1601_p11, %p1934_p12 }
 0x2f1   : > { %1761 = dma.done.wait (!%p1598_p13), %s1480_s22, 128  }
 0x2f2   : > { %1763 = vsyncadd (!%p1598_p13), %s1480_s22, 4294967168  ;;  %s22_s11 = sadd.s32 1, %s1802_s11   ;;  %s2604_s20 = sld [smem:[#allocation8_spill]] }
 0x2f3   : > { %p19_p0 = scmp.ge.s32.totalorder %s22_s11, 6   ;;  %s2605_s17 = sld [smem:[#allocation9_spill]] }
 0x2f4   : > { %s2606_s26 = smov %s1770_s27  ;;  %s2607_s27 = smov %s1774_s28 }
 0x2f5   : > { %s2608_s28 = smov %s1939_s24  ;;  %s2609_s29 = smov %s1782_s30 }
 0x2f6   : > { %s2610_s30 = smov %s1942_s25  ;;  %s2611_s8 = smov %s1794_s10 }
 0x2f7   : > { %s2612_s9 = smov %s1798_s6  ;;  %21 = sbr.rel (!%p19_p0) target bundleno = 9 (0x9), region = 137 }
 0x2f8   : > { %s2613_s10 = smov %s2604_s20 }
 0x2f9   : > { %s2614_s6 = smov %s2605_s17 }
 0x2fe   :  { %1485 = vsyncpa [#allocation6], 1 }
 0x2ff   :  { %1487 = vsyncpa [#allocation6 + $0x1], 1 }

</bundles_post_ra>
